<compile_context>
chip_gen: v6e
topology: v6e:2x2x1
jax: 0.10.0
libtpu: 0.0.40
codegen_flags: <defaults>
</compile_context>

<pallas_src>
import functools

import jax
import jax.numpy as jnp
from jax import lax
from jax.experimental import pallas as pl
from jax.experimental.pallas import tpu as pltpu


# ----------------------------------------------------------------------------
# Deterministic, in-script "config" (stands in for the PyTorch Config object).
# Enabled branches: supervised fmo_loss (with temporal flip + min),
# self-supervised model loss, self-supervised sharp-mask entropy loss.
# ----------------------------------------------------------------------------
class Config:
    fmo_train_steps = 4
    fmo_steps = 4
    use_supervised = True
    use_selfsupervised_model = True
    use_selfsupervised_sharp_mask = True
    sharp_mask_type = "entropy"
    # TODO(synk): oflow_loss (grid_sample warp) and temporal_consistency_loss
    # (normalized_cross_correlation_channels is not defined in the reference
    # source) have no clean Pallas equivalent here; branch disabled.
    use_selfsupervised_timeconsistency = False
    timeconsistency_type = "oflow"
    use_latent_learning = False


# number of scalar partial sums carried across spatial tiles
_N_ACC = 10
_ACC_ROWS = 16   # sublane-padded accumulator tile rows (>= _N_ACC, multiple of 8)


# ----------------------------------------------------------------------------
# Pallas kernel: grid = (batch, spatial_tile).  Each step loads one lane-dense
# spatial tile of every frame, accumulates scalar partial sums in VMEM scratch,
# and on the last tile finalizes the three per-sample loss scalars into an
# (8, 128) output tile.
# ----------------------------------------------------------------------------
def _fmo_loss_kernel(renders_ref, hs_ref, inp_ref, out_ref, acc_ref, *,
                     fmo_steps, hw_total):
    f32 = jnp.float32
    eps = float(jnp.finfo(f32).eps)

    t = pl.program_id(1)
    nt = pl.num_programs(1)

    @pl.when(t == 0)
    def _init():
        acc_ref[...] = jnp.zeros_like(acc_ref)

    Yp = renders_ref[0].astype(f32)     # (S, 4, TILE)  predicted renders
    Y = hs_ref[0].astype(f32)           # (St, 4, TILE) hs_frames (GT)
    inp = inp_ref[0].astype(f32)        # (6, TILE)     input_batch
    S = Yp.shape[0]
    St = Y.shape[0]

    # ---- shared (flip-invariant) quantities, computed once ----------------
    alpha_all = Yp[:, 3:4]              # (S,1,TILE)  predicted alpha, all frames
    rgba_all = Yp[:, 0:3] * alpha_all   # (S,3,TILE)  premultiplied RGB

    YpM = alpha_all[:St]                # (St,1,TILE)
    P = rgba_all[:St]                   # (St,3,TILE)  YpF * YpM
    YM = Y[:, 3:4]                      # (St,1,TILE)
    YF = Y[:, 0:3]                      # (St,3,TILE)
    Q = YF * YM                         # (St,3,TILE)  YF * YM
    YMb = (YM > 0).astype(f32)          # (St,1,TILE)  binarized mask (shared)

    sum_mask = jnp.sum(YMb)             # sum(1-YMb) derived at finalize

    # ---- supervised loss 1: Yp[s] vs Y[s] (vectorized over frames) --------
    d1 = jnp.abs(YpM - YM)
    on1 = jnp.sum(d1 * YMb)
    tot1 = jnp.sum(d1)                  # off-mask sum = tot1 - on1
    fl1 = jnp.sum(jnp.abs(P - Q) * YMb)

    # ---- supervised loss 2: Yp[s] vs Y[St-1-s] (temporal flip in-VMEM) -----
    on2 = jnp.float32(0.0)
    tot2 = jnp.float32(0.0)
    fl2 = jnp.float32(0.0)
    for s in range(St):                 # static unroll; S-axis addressing only
        r = St - 1 - s
        d = jnp.abs(YpM[s] - YM[r])
        tot2 = tot2 + jnp.sum(d)
        on2 = on2 + jnp.sum(d * YMb[r])
        fl2 = fl2 + jnp.sum(jnp.abs(P[s] - Q[r]) * YMb[r])

    # ---- self-supervised model loss partials (all S render frames) --------
    rgb_m = jnp.mean(rgba_all, axis=0)  # (3,TILE)
    a_m = jnp.mean(alpha_all, axis=0)   # (1,TILE)
    expected = inp[3:6] * (1.0 - a_m) + rgb_m
    roi = (jnp.mean(YM, axis=0) > 0).astype(f32)         # (1,TILE)
    ml = jnp.sum(jnp.abs(expected - inp[0:3]) * roi)
    roi_sum = jnp.sum(roi)

    # ---- sharp-mask entropy partial (all S render frames) -----------------
    posr = alpha_all                     # (S,1,TILE)
    negr = 1.0 - posr
    ent = jnp.sum(-posr * jnp.log2(posr + eps) - negr * jnp.log2(negr + eps))

    # ---- accumulate the scalar partials (scalar broadcast across a row) ---
    vals = (sum_mask, on1, tot1, fl1, on2, tot2, fl2, ml, roi_sum, ent)
    arow = lax.broadcasted_iota(jnp.int32, (_ACC_ROWS, 128), 0)
    delta = jnp.zeros((_ACC_ROWS, 128), f32)
    for i, v in enumerate(vals):
        delta = delta + jnp.where(arow == i, v, 0.0)
    acc_ref[...] = acc_ref[...] + delta

    # ---- finalize on the last spatial tile ---------------------------------
    @pl.when(t == nt - 1)
    def _finalize():
        acc = acc_ref[...]

        def rowv(i):                     # (1,128): scalar replicated over lanes
            return acc[i:i + 1, :]

        sum_mask_v = rowv(0)
        on1_v, tot1_v, fl1_v = rowv(1), rowv(2), rowv(3)
        on2_v, tot2_v, fl2_v = rowv(4), rowv(5), rowv(6)
        ml_v, roi_v, ent_v = rowv(7), rowv(8), rowv(9)

        denom_on = sum_mask_v + eps
        denom_off = float(St * hw_total) - sum_mask_v + eps
        denom_f = 3.0 * sum_mask_v + eps

        def sup_loss(on, tot, fl):
            mloss = 0.5 * on / denom_on + 0.5 * (tot - on) / denom_off
            return 2.0 * mloss + fl / denom_f

        supervised = jnp.minimum(sup_loss(on1_v, tot1_v, fl1_v),
                                 sup_loss(on2_v, tot2_v, fl2_v))
        model_loss = ml_v / (roi_v + 0.01)            # 4-D torch path -> +0.01
        sharp = ent_v / float(hw_total) / fmo_steps

        orow = lax.broadcasted_iota(jnp.int32, (8, 128), 0)
        tile = (jnp.where(orow == 0, supervised, 0.0)
                + jnp.where(orow == 1, model_loss, 0.0)
                + jnp.where(orow == 2, sharp, 0.0))
        out_ref[0] = tile.astype(out_ref.dtype)


# ----------------------------------------------------------------------------
# Wrapper: layout plumbing in plain JAX, all reductions in the Pallas kernel.
# ----------------------------------------------------------------------------
def _pick_spatial_tile(hw, max_tile=16384):
    """Largest tile <= max_tile that divides hw and is a multiple of 128."""
    if hw <= max_tile or hw % 128 != 0:
        return hw
    t = (max_tile // 128) * 128
    while t >= 128:
        if hw % t == 0:
            return t
        t -= 128
    return hw


def fmo_loss_forward(renders_all, hs_frames, input_batch, config=Config):
    B, S, C, H, W = renders_all.shape
    assert C >= 4, "renders need at least RGBA channels"
    Bh, St, Ch, Hh, Wh = hs_frames.shape
    assert Bh == B and (Hh, Wh) == (H, W) and Ch == 4
    assert St <= S
    HW = H * W

    # lane-dense layout: flatten the spatial dims into the lane axis.
    # Inputs are passed in their NATIVE dtype (no f32 upcast in the wrapper);
    # the kernel accumulates in f32.
    renders = renders_all[:, :, :4].reshape(B, S, 4, HW)
    hs = hs_frames.reshape(B, St, 4, HW)
    inp = input_batch.reshape(B, 6, HW)

    tile = _pick_spatial_tile(HW)
    nt = HW // tile

    itemsize = lambda a: jnp.dtype(a.dtype).itemsize
    block_bytes = (2 * (S * 4 * tile * itemsize(renders)
                        + St * 4 * tile * itemsize(hs)
                        + 6 * tile * itemsize(inp))
                   + 2 * 8 * 128 * 4 + _ACC_ROWS * 128 * 4)
    # explicit scoped-VMEM budget with headroom; capped at v7x's 64 MiB.
    vmem_limit = int(min(max(6 * block_bytes, 16 << 20), 64 << 20))

    kernel = functools.partial(_fmo_loss_kernel,
                               fmo_steps=float(config.fmo_steps),
                               hw_total=HW)

    # Batch axis is "parallel" (megacore on v7x when B > 1); the spatial-tile
    # reduction axis is "arbitrary" and comes last.
    out = pl.pallas_call(
        kernel,
        out_shape=jax.ShapeDtypeStruct((B, 8, 128), jnp.float32),
        grid=(B, nt),
        in_specs=[
            pl.BlockSpec((1, S, 4, tile), lambda b, t: (b, 0, 0, t)),
            pl.BlockSpec((1, St, 4, tile), lambda b, t: (b, 0, 0, t)),
            pl.BlockSpec((1, 6, tile), lambda b, t: (b, 0, t)),
        ],
        out_specs=pl.BlockSpec((1, 8, 128), lambda b, t: (b, 0, 0)),
        scratch_shapes=[pltpu.VMEM((_ACC_ROWS, 128), jnp.float32)],
        compiler_params=pltpu.CompilerParams(
            dimension_semantics=("parallel", "arbitrary"),
            vmem_limit_bytes=vmem_limit),
    )(renders, hs, inp)

    supervised_loss = out[:, 0, 0]
    model_loss = out[:, 1, 0]
    loss_sharp_mask = out[:, 2, 0]
    loss_timecons = 0.0 * supervised_loss
    loss_latent = 0.0 * supervised_loss
    loss = (supervised_loss + loss_timecons + model_loss + loss_sharp_mask
            + loss_latent)
    # reduction == 'none' tuple, same order as the PyTorch module
    return (supervised_loss, model_loss, loss_sharp_mask, loss_timecons,
            loss_latent, loss)


# ----------------------------------------------------------------------------
# Pure-JAX reference (mirrors the torch code) for a correctness check.
# ----------------------------------------------------------------------------
def _reference(renders_all, hs_frames, input_batch, config=Config):
    f32 = jnp.float32
    eps = jnp.finfo(f32).eps
    renders = renders_all[:, :, :4]
    rsup = renders[:, :config.fmo_train_steps]

    def batch_loss(YpM, YM, YMb):
        losses = jnp.abs(YpM * YMb - YM * YMb)
        if losses.ndim > 4:
            return losses.sum(axis=(1, 2, 3, 4)) / (YMb.sum(axis=(1, 2, 3, 4)) + eps)
        return losses.sum(axis=(1, 2, 3)) / (YMb.sum(axis=(1, 2, 3)) + 0.01)

    def fmo_loss(Yp, Y):
        YM, YpM = Y[:, :, 3:4], Yp[:, :, 3:4]
        YF, YpF = Y[:, :, :3], Yp[:, :, :3]
        YMb = (YM > 0).astype(f32)
        mloss = 0.5 * batch_loss(YpM, YM, YMb) + 0.5 * batch_loss(YpM, YM, 1 - YMb)
        YMb3 = jnp.concatenate([YMb, YMb, YMb], axis=2)
        floss = batch_loss(YpF * YpM, YF * YM, YMb3)
        return 2 * mloss + floss

    supervised = jnp.minimum(fmo_loss(rsup, hs_frames),
                             fmo_loss(rsup, hs_frames[:, ::-1]))

    modelled = jnp.concatenate(
        [renders[:, :, :3] * renders[:, :, 3:], renders[:, :, 3:]], axis=2).mean(axis=1)
    roi = (hs_frames[:, :, 3:].mean(axis=1) > 0).astype(f32)
    expected = input_batch[:, 3:] * (1 - modelled[:, 3:]) + modelled[:, :3]
    model_loss = batch_loss(expected, input_batch[:, :3], roi)

    posr = renders[:, :, 3]
    ent = -posr * jnp.log2(posr + eps) - (1 - posr) * jnp.log2(1 - posr + eps)
    sharp = ent.mean(axis=(2, 3)).sum(axis=1) / config.fmo_steps

    timecons = 0 * supervised
    latent = 0 * supervised
    total = supervised + timecons + model_loss + sharp + latent
    return (supervised, model_loss, sharp, timecons, latent, total)


if __name__ == "__main__":
    B, S, H, W = 2, 4, 16, 16
    key = jax.random.PRNGKey(0)
    k1, k2, k3 = jax.random.split(key, 3)

    # predicted renders in (0,1) (RGB + alpha)
    renders_all = jax.nn.sigmoid(jax.random.normal(k1, (B, S, 4, H, W), jnp.float32))
    # high-speed GT frames: RGB uniform, alpha with an exact-zero background region
    hs_rgb = jax.random.uniform(k2, (B, S, 3, H, W), jnp.float32)
    hs_alpha = jnp.maximum(jax.random.uniform(k3, (B, S, 1, H, W), jnp.float32) - 0.5, 0.0)
    hs_frames = jnp.concatenate([hs_rgb, hs_alpha], axis=2)
    # input batch: 3 image channels + 3 background channels
    input_batch = jax.random.uniform(jax.random.PRNGKey(1), (B, 6, H, W), jnp.float32)

    outs = fmo_loss_forward(renders_all, hs_frames, input_batch)
    outs = jax.block_until_ready(outs)

    refs = _reference(renders_all, hs_frames, input_batch)
    for got, want in zip(outs, refs):
        assert jnp.allclose(got, want, rtol=1e-4, atol=1e-4), (got, want)

    print("KERNEL_OK")
</pallas_src>

<mosaic_0001>
module attributes {stable_mosaic.version = 11 : i64} {
  func.func @_fmo_loss_kernel(%arg0: i32, %arg1: i32, %arg2: memref<1x4x4x256xf32, #tpu.memory_space<vmem>>, %arg3: memref<1x4x4x256xf32, #tpu.memory_space<vmem>>, %arg4: memref<1x6x256xf32, #tpu.memory_space<vmem>>, %arg5: memref<1x8x128xf32, #tpu.memory_space<vmem>>, %arg6: memref<16x128xf32, #tpu.memory_space<vmem>>) attributes {dimension_semantics = [#tpu.dimension_semantics<parallel>, #tpu.dimension_semantics<arbitrary>], iteration_bounds = array<i64: 2, 1>, scalar_prefetch = 0 : i64, scratch_operands = 1 : i64, tpu.core_type = #tpu.core_type<tc>, window_params = [{transform_indices = @transform_0, window_bounds = array<i64: 1, 4, 4, 256>}, {transform_indices = @transform_1, window_bounds = array<i64: 1, 4, 4, 256>}, {transform_indices = @transform_2, window_bounds = array<i64: 1, 6, 256>}, {transform_indices = @transform_3, window_bounds = array<i64: 1, 8, 128>}]} {
    %c0_i32 = arith.constant 0 : i32
    %0 = arith.cmpi eq, %arg1, %c0_i32 : i32
    %1 = arith.extui %0 : i1 to i32
    %c0_i32_0 = arith.constant 0 : i32
    %2 = arith.cmpi ne, %1, %c0_i32_0 : i32
    scf.if %2 {
      %cst_65 = arith.constant 0.000000e+00 : f32
      %303 = vector.broadcast %cst_65 : f32 to vector<16x128xf32>
      %c0_66 = arith.constant 0 : index
      %c0_67 = arith.constant 0 : index
      %304 = vector.load %arg6[%c0_66, %c0_67] : memref<16x128xf32, #tpu.memory_space<vmem>>, vector<16x128xf32>
      tpu.vector_store %arg6[%c0_66, %c0_67], %303 {strides = array<i32>} : memref<16x128xf32, #tpu.memory_space<vmem>>, vector<16x128xf32>,
    } else {
    }
    %c0 = arith.constant 0 : index
    %c0_1 = arith.constant 0 : index
    %c0_2 = arith.constant 0 : index
    %c0_3 = arith.constant 0 : index
    %3 = vector.load %arg2[%c0, %c0_1, %c0_2, %c0_3] : memref<1x4x4x256xf32, #tpu.memory_space<vmem>>, vector<1x4x4x256xf32>
    %4 = vector.shape_cast %3 : vector<1x4x4x256xf32> to vector<4x4x256xf32>
    %c0_4 = arith.constant 0 : index
    %c0_5 = arith.constant 0 : index
    %c0_6 = arith.constant 0 : index
    %c0_7 = arith.constant 0 : index
    %5 = vector.load %arg3[%c0_4, %c0_5, %c0_6, %c0_7] : memref<1x4x4x256xf32, #tpu.memory_space<vmem>>, vector<1x4x4x256xf32>
    %6 = vector.shape_cast %5 : vector<1x4x4x256xf32> to vector<4x4x256xf32>
    %c0_8 = arith.constant 0 : index
    %c0_9 = arith.constant 0 : index
    %c0_10 = arith.constant 0 : index
    %7 = vector.load %arg4[%c0_8, %c0_9, %c0_10] : memref<1x6x256xf32, #tpu.memory_space<vmem>>, vector<1x6x256xf32>
    %8 = vector.shape_cast %7 : vector<1x6x256xf32> to vector<6x256xf32>
    %9 = vector.extract_strided_slice %4 {offsets = [0, 3, 0], sizes = [4, 1, 256], strides = [1, 1, 1]} : vector<4x4x256xf32> to vector<4x1x256xf32>
    %10 = vector.extract_strided_slice %4 {offsets = [0, 0, 0], sizes = [4, 3, 256], strides = [1, 1, 1]} : vector<4x4x256xf32> to vector<4x3x256xf32>
    %11 = vector.broadcast %9 : vector<4x1x256xf32> to vector<4x3x256xf32>
    %12 = arith.mulf %10, %11 : vector<4x3x256xf32>
    %13 = vector.extract_strided_slice %6 {offsets = [0, 3, 0], sizes = [4, 1, 256], strides = [1, 1, 1]} : vector<4x4x256xf32> to vector<4x1x256xf32>
    %14 = vector.extract_strided_slice %6 {offsets = [0, 0, 0], sizes = [4, 3, 256], strides = [1, 1, 1]} : vector<4x4x256xf32> to vector<4x3x256xf32>
    %15 = vector.broadcast %13 : vector<4x1x256xf32> to vector<4x3x256xf32>
    %16 = arith.mulf %14, %15 : vector<4x3x256xf32>
    %cst = arith.constant 0.000000e+00 : f32
    %17 = vector.broadcast %cst : f32 to vector<4x1x256xf32>
    %18 = arith.cmpf ogt, %13, %17 : vector<4x1x256xf32>
    %19 = arith.extui %18 : vector<4x1x256xi1> to vector<4x1x256xi32>
    %20 = arith.sitofp %19 : vector<4x1x256xi32> to vector<4x1x256xf32>
    %21 = vector.shape_cast %20 : vector<4x1x256xf32> to vector<1x4x1x256xf32>
    %cst_11 = arith.constant dense<0.000000e+00> : vector<1xf32>
    %22 = vector.multi_reduction <add>, %21, %cst_11 [1, 2, 3] : vector<1x4x1x256xf32> to vector<1xf32>
    %23 = vector.shape_cast %22 : vector<1xf32> to vector<1x1x1x1xf32>
    %24 = vector.extract %23[0, 0, 0, 0] : f32 from vector<1x1x1x1xf32>
    %25 = arith.subf %9, %13 : vector<4x1x256xf32>
    %26 = math.absf %25 : vector<4x1x256xf32>
    %27 = arith.mulf %26, %20 : vector<4x1x256xf32>
    %28 = vector.shape_cast %27 : vector<4x1x256xf32> to vector<1x4x1x256xf32>
    %cst_12 = arith.constant dense<0.000000e+00> : vector<1xf32>
    %29 = vector.multi_reduction <add>, %28, %cst_12 [1, 2, 3] : vector<1x4x1x256xf32> to vector<1xf32>
    %30 = vector.shape_cast %29 : vector<1xf32> to vector<1x1x1x1xf32>
    %31 = vector.extract %30[0, 0, 0, 0] : f32 from vector<1x1x1x1xf32>
    %32 = vector.shape_cast %26 : vector<4x1x256xf32> to vector<1x4x1x256xf32>
    %cst_13 = arith.constant dense<0.000000e+00> : vector<1xf32>
    %33 = vector.multi_reduction <add>, %32, %cst_13 [1, 2, 3] : vector<1x4x1x256xf32> to vector<1xf32>
    %34 = vector.shape_cast %33 : vector<1xf32> to vector<1x1x1x1xf32>
    %35 = vector.extract %34[0, 0, 0, 0] : f32 from vector<1x1x1x1xf32>
    %36 = arith.subf %12, %16 : vector<4x3x256xf32>
    %37 = math.absf %36 : vector<4x3x256xf32>
    %38 = vector.broadcast %20 : vector<4x1x256xf32> to vector<4x3x256xf32>
    %39 = arith.mulf %37, %38 : vector<4x3x256xf32>
    %40 = vector.shape_cast %39 : vector<4x3x256xf32> to vector<1x4x3x256xf32>
    %cst_14 = arith.constant dense<0.000000e+00> : vector<1xf32>
    %41 = vector.multi_reduction <add>, %40, %cst_14 [1, 2, 3] : vector<1x4x3x256xf32> to vector<1xf32>
    %42 = vector.shape_cast %41 : vector<1xf32> to vector<1x1x1x1xf32>
    %43 = vector.extract %42[0, 0, 0, 0] : f32 from vector<1x1x1x1xf32>
    %44 = vector.extract_strided_slice %9 {offsets = [0, 0, 0], sizes = [1, 1, 256], strides = [1, 1, 1]} : vector<4x1x256xf32> to vector<1x1x256xf32>
    %45 = vector.shape_cast %44 : vector<1x1x256xf32> to vector<1x256xf32>
    %46 = vector.extract_strided_slice %13 {offsets = [3, 0, 0], sizes = [1, 1, 256], strides = [1, 1, 1]} : vector<4x1x256xf32> to vector<1x1x256xf32>
    %47 = vector.shape_cast %46 : vector<1x1x256xf32> to vector<1x256xf32>
    %48 = arith.subf %45, %47 : vector<1x256xf32>
    %49 = math.absf %48 : vector<1x256xf32>
    %50 = vector.shape_cast %49 : vector<1x256xf32> to vector<1x1x256xf32>
    %cst_15 = arith.constant dense<0.000000e+00> : vector<1xf32>
    %51 = vector.multi_reduction <add>, %50, %cst_15 [1, 2] : vector<1x1x256xf32> to vector<1xf32>
    %52 = vector.shape_cast %51 : vector<1xf32> to vector<1x1x1xf32>
    %53 = vector.extract %52[0, 0, 0] : f32 from vector<1x1x1xf32>
    %cst_16 = arith.constant 0.000000e+00 : f32
    %54 = arith.addf %cst_16, %53 : f32
    %55 = vector.extract_strided_slice %20 {offsets = [3, 0, 0], sizes = [1, 1, 256], strides = [1, 1, 1]} : vector<4x1x256xf32> to vector<1x1x256xf32>
    %56 = vector.shape_cast %55 : vector<1x1x256xf32> to vector<1x256xf32>
    %57 = arith.mulf %49, %56 : vector<1x256xf32>
    %58 = vector.shape_cast %57 : vector<1x256xf32> to vector<1x1x256xf32>
    %cst_17 = arith.constant dense<0.000000e+00> : vector<1xf32>
    %59 = vector.multi_reduction <add>, %58, %cst_17 [1, 2] : vector<1x1x256xf32> to vector<1xf32>
    %60 = vector.shape_cast %59 : vector<1xf32> to vector<1x1x1xf32>
    %61 = vector.extract %60[0, 0, 0] : f32 from vector<1x1x1xf32>
    %cst_18 = arith.constant 0.000000e+00 : f32
    %62 = arith.addf %cst_18, %61 : f32
    %63 = vector.extract_strided_slice %12 {offsets = [0, 0, 0], sizes = [1, 3, 256], strides = [1, 1, 1]} : vector<4x3x256xf32> to vector<1x3x256xf32>
    %64 = vector.shape_cast %63 : vector<1x3x256xf32> to vector<3x256xf32>
    %65 = vector.extract_strided_slice %16 {offsets = [3, 0, 0], sizes = [1, 3, 256], strides = [1, 1, 1]} : vector<4x3x256xf32> to vector<1x3x256xf32>
    %66 = vector.shape_cast %65 : vector<1x3x256xf32> to vector<3x256xf32>
    %67 = arith.subf %64, %66 : vector<3x256xf32>
    %68 = math.absf %67 : vector<3x256xf32>
    %69 = vector.extract_strided_slice %20 {offsets = [3, 0, 0], sizes = [1, 1, 256], strides = [1, 1, 1]} : vector<4x1x256xf32> to vector<1x1x256xf32>
    %70 = vector.shape_cast %69 : vector<1x1x256xf32> to vector<1x256xf32>
    %71 = vector.broadcast %70 : vector<1x256xf32> to vector<3x256xf32>
    %72 = arith.mulf %68, %71 : vector<3x256xf32>
    %73 = vector.shape_cast %72 : vector<3x256xf32> to vector<1x3x256xf32>
    %cst_19 = arith.constant dense<0.000000e+00> : vector<1xf32>
    %74 = vector.multi_reduction <add>, %73, %cst_19 [1, 2] : vector<1x3x256xf32> to vector<1xf32>
    %75 = vector.shape_cast %74 : vector<1xf32> to vector<1x1x1xf32>
    %76 = vector.extract %75[0, 0, 0] : f32 from vector<1x1x1xf32>
    %cst_20 = arith.constant 0.000000e+00 : f32
    %77 = arith.addf %cst_20, %76 : f32
    %78 = vector.extract_strided_slice %9 {offsets = [1, 0, 0], sizes = [1, 1, 256], strides = [1, 1, 1]} : vector<4x1x256xf32> to vector<1x1x256xf32>
    %79 = vector.shape_cast %78 : vector<1x1x256xf32> to vector<1x256xf32>
    %80 = vector.extract_strided_slice %13 {offsets = [2, 0, 0], sizes = [1, 1, 256], strides = [1, 1, 1]} : vector<4x1x256xf32> to vector<1x1x256xf32>
    %81 = vector.shape_cast %80 : vector<1x1x256xf32> to vector<1x256xf32>
    %82 = arith.subf %79, %81 : vector<1x256xf32>
    %83 = math.absf %82 : vector<1x256xf32>
    %84 = vector.shape_cast %83 : vector<1x256xf32> to vector<1x1x256xf32>
    %cst_21 = arith.constant dense<0.000000e+00> : vector<1xf32>
    %85 = vector.multi_reduction <add>, %84, %cst_21 [1, 2] : vector<1x1x256xf32> to vector<1xf32>
    %86 = vector.shape_cast %85 : vector<1xf32> to vector<1x1x1xf32>
    %87 = vector.extract %86[0, 0, 0] : f32 from vector<1x1x1xf32>
    %88 = arith.addf %54, %87 : f32
    %89 = vector.extract_strided_slice %20 {offsets = [2, 0, 0], sizes = [1, 1, 256], strides = [1, 1, 1]} : vector<4x1x256xf32> to vector<1x1x256xf32>
    %90 = vector.shape_cast %89 : vector<1x1x256xf32> to vector<1x256xf32>
    %91 = arith.mulf %83, %90 : vector<1x256xf32>
    %92 = vector.shape_cast %91 : vector<1x256xf32> to vector<1x1x256xf32>
    %cst_22 = arith.constant dense<0.000000e+00> : vector<1xf32>
    %93 = vector.multi_reduction <add>, %92, %cst_22 [1, 2] : vector<1x1x256xf32> to vector<1xf32>
    %94 = vector.shape_cast %93 : vector<1xf32> to vector<1x1x1xf32>
    %95 = vector.extract %94[0, 0, 0] : f32 from vector<1x1x1xf32>
    %96 = arith.addf %62, %95 : f32
    %97 = vector.extract_strided_slice %12 {offsets = [1, 0, 0], sizes = [1, 3, 256], strides = [1, 1, 1]} : vector<4x3x256xf32> to vector<1x3x256xf32>
    %98 = vector.shape_cast %97 : vector<1x3x256xf32> to vector<3x256xf32>
    %99 = vector.extract_strided_slice %16 {offsets = [2, 0, 0], sizes = [1, 3, 256], strides = [1, 1, 1]} : vector<4x3x256xf32> to vector<1x3x256xf32>
    %100 = vector.shape_cast %99 : vector<1x3x256xf32> to vector<3x256xf32>
    %101 = arith.subf %98, %100 : vector<3x256xf32>
    %102 = math.absf %101 : vector<3x256xf32>
    %103 = vector.extract_strided_slice %20 {offsets = [2, 0, 0], sizes = [1, 1, 256], strides = [1, 1, 1]} : vector<4x1x256xf32> to vector<1x1x256xf32>
    %104 = vector.shape_cast %103 : vector<1x1x256xf32> to vector<1x256xf32>
    %105 = vector.broadcast %104 : vector<1x256xf32> to vector<3x256xf32>
    %106 = arith.mulf %102, %105 : vector<3x256xf32>
    %107 = vector.shape_cast %106 : vector<3x256xf32> to vector<1x3x256xf32>
    %cst_23 = arith.constant dense<0.000000e+00> : vector<1xf32>
    %108 = vector.multi_reduction <add>, %107, %cst_23 [1, 2] : vector<1x3x256xf32> to vector<1xf32>
    %109 = vector.shape_cast %108 : vector<1xf32> to vector<1x1x1xf32>
    %110 = vector.extract %109[0, 0, 0] : f32 from vector<1x1x1xf32>
    %111 = arith.addf %77, %110 : f32
    %112 = vector.extract_strided_slice %9 {offsets = [2, 0, 0], sizes = [1, 1, 256], strides = [1, 1, 1]} : vector<4x1x256xf32> to vector<1x1x256xf32>
    %113 = vector.shape_cast %112 : vector<1x1x256xf32> to vector<1x256xf32>
    %114 = vector.extract_strided_slice %13 {offsets = [1, 0, 0], sizes = [1, 1, 256], strides = [1, 1, 1]} : vector<4x1x256xf32> to vector<1x1x256xf32>
    %115 = vector.shape_cast %114 : vector<1x1x256xf32> to vector<1x256xf32>
    %116 = arith.subf %113, %115 : vector<1x256xf32>
    %117 = math.absf %116 : vector<1x256xf32>
    %118 = vector.shape_cast %117 : vector<1x256xf32> to vector<1x1x256xf32>
    %cst_24 = arith.constant dense<0.000000e+00> : vector<1xf32>
    %119 = vector.multi_reduction <add>, %118, %cst_24 [1, 2] : vector<1x1x256xf32> to vector<1xf32>
    %120 = vector.shape_cast %119 : vector<1xf32> to vector<1x1x1xf32>
    %121 = vector.extract %120[0, 0, 0] : f32 from vector<1x1x1xf32>
    %122 = arith.addf %88, %121 : f32
    %123 = vector.extract_strided_slice %20 {offsets = [1, 0, 0], sizes = [1, 1, 256], strides = [1, 1, 1]} : vector<4x1x256xf32> to vector<1x1x256xf32>
    %124 = vector.shape_cast %123 : vector<1x1x256xf32> to vector<1x256xf32>
    %125 = arith.mulf %117, %124 : vector<1x256xf32>
    %126 = vector.shape_cast %125 : vector<1x256xf32> to vector<1x1x256xf32>
    %cst_25 = arith.constant dense<0.000000e+00> : vector<1xf32>
    %127 = vector.multi_reduction <add>, %126, %cst_25 [1, 2] : vector<1x1x256xf32> to vector<1xf32>
    %128 = vector.shape_cast %127 : vector<1xf32> to vector<1x1x1xf32>
    %129 = vector.extract %128[0, 0, 0] : f32 from vector<1x1x1xf32>
    %130 = arith.addf %96, %129 : f32
    %131 = vector.extract_strided_slice %12 {offsets = [2, 0, 0], sizes = [1, 3, 256], strides = [1, 1, 1]} : vector<4x3x256xf32> to vector<1x3x256xf32>
    %132 = vector.shape_cast %131 : vector<1x3x256xf32> to vector<3x256xf32>
    %133 = vector.extract_strided_slice %16 {offsets = [1, 0, 0], sizes = [1, 3, 256], strides = [1, 1, 1]} : vector<4x3x256xf32> to vector<1x3x256xf32>
    %134 = vector.shape_cast %133 : vector<1x3x256xf32> to vector<3x256xf32>
    %135 = arith.subf %132, %134 : vector<3x256xf32>
    %136 = math.absf %135 : vector<3x256xf32>
    %137 = vector.extract_strided_slice %20 {offsets = [1, 0, 0], sizes = [1, 1, 256], strides = [1, 1, 1]} : vector<4x1x256xf32> to vector<1x1x256xf32>
    %138 = vector.shape_cast %137 : vector<1x1x256xf32> to vector<1x256xf32>
    %139 = vector.broadcast %138 : vector<1x256xf32> to vector<3x256xf32>
    %140 = arith.mulf %136, %139 : vector<3x256xf32>
    %141 = vector.shape_cast %140 : vector<3x256xf32> to vector<1x3x256xf32>
    %cst_26 = arith.constant dense<0.000000e+00> : vector<1xf32>
    %142 = vector.multi_reduction <add>, %141, %cst_26 [1, 2] : vector<1x3x256xf32> to vector<1xf32>
    %143 = vector.shape_cast %142 : vector<1xf32> to vector<1x1x1xf32>
    %144 = vector.extract %143[0, 0, 0] : f32 from vector<1x1x1xf32>
    %145 = arith.addf %111, %144 : f32
    %146 = vector.extract_strided_slice %9 {offsets = [3, 0, 0], sizes = [1, 1, 256], strides = [1, 1, 1]} : vector<4x1x256xf32> to vector<1x1x256xf32>
    %147 = vector.shape_cast %146 : vector<1x1x256xf32> to vector<1x256xf32>
    %148 = vector.extract_strided_slice %13 {offsets = [0, 0, 0], sizes = [1, 1, 256], strides = [1, 1, 1]} : vector<4x1x256xf32> to vector<1x1x256xf32>
    %149 = vector.shape_cast %148 : vector<1x1x256xf32> to vector<1x256xf32>
    %150 = arith.subf %147, %149 : vector<1x256xf32>
    %151 = math.absf %150 : vector<1x256xf32>
    %152 = vector.shape_cast %151 : vector<1x256xf32> to vector<1x1x256xf32>
    %cst_27 = arith.constant dense<0.000000e+00> : vector<1xf32>
    %153 = vector.multi_reduction <add>, %152, %cst_27 [1, 2] : vector<1x1x256xf32> to vector<1xf32>
    %154 = vector.shape_cast %153 : vector<1xf32> to vector<1x1x1xf32>
    %155 = vector.extract %154[0, 0, 0] : f32 from vector<1x1x1xf32>
    %156 = arith.addf %122, %155 : f32
    %157 = vector.extract_strided_slice %20 {offsets = [0, 0, 0], sizes = [1, 1, 256], strides = [1, 1, 1]} : vector<4x1x256xf32> to vector<1x1x256xf32>
    %158 = vector.shape_cast %157 : vector<1x1x256xf32> to vector<1x256xf32>
    %159 = arith.mulf %151, %158 : vector<1x256xf32>
    %160 = vector.shape_cast %159 : vector<1x256xf32> to vector<1x1x256xf32>
    %cst_28 = arith.constant dense<0.000000e+00> : vector<1xf32>
    %161 = vector.multi_reduction <add>, %160, %cst_28 [1, 2] : vector<1x1x256xf32> to vector<1xf32>
    %162 = vector.shape_cast %161 : vector<1xf32> to vector<1x1x1xf32>
    %163 = vector.extract %162[0, 0, 0] : f32 from vector<1x1x1xf32>
    %164 = arith.addf %130, %163 : f32
    %165 = vector.extract_strided_slice %12 {offsets = [3, 0, 0], sizes = [1, 3, 256], strides = [1, 1, 1]} : vector<4x3x256xf32> to vector<1x3x256xf32>
    %166 = vector.shape_cast %165 : vector<1x3x256xf32> to vector<3x256xf32>
    %167 = vector.extract_strided_slice %16 {offsets = [0, 0, 0], sizes = [1, 3, 256], strides = [1, 1, 1]} : vector<4x3x256xf32> to vector<1x3x256xf32>
    %168 = vector.shape_cast %167 : vector<1x3x256xf32> to vector<3x256xf32>
    %169 = arith.subf %166, %168 : vector<3x256xf32>
    %170 = math.absf %169 : vector<3x256xf32>
    %171 = vector.extract_strided_slice %20 {offsets = [0, 0, 0], sizes = [1, 1, 256], strides = [1, 1, 1]} : vector<4x1x256xf32> to vector<1x1x256xf32>
    %172 = vector.shape_cast %171 : vector<1x1x256xf32> to vector<1x256xf32>
    %173 = vector.broadcast %172 : vector<1x256xf32> to vector<3x256xf32>
    %174 = arith.mulf %170, %173 : vector<3x256xf32>
    %175 = vector.shape_cast %174 : vector<3x256xf32> to vector<1x3x256xf32>
    %cst_29 = arith.constant dense<0.000000e+00> : vector<1xf32>
    %176 = vector.multi_reduction <add>, %175, %cst_29 [1, 2] : vector<1x3x256xf32> to vector<1xf32>
    %177 = vector.shape_cast %176 : vector<1xf32> to vector<1x1x1xf32>
    %178 = vector.extract %177[0, 0, 0] : f32 from vector<1x1x1xf32>
    %179 = arith.addf %145, %178 : f32
    %cst_30 = arith.constant dense<0.000000e+00> : vector<3x256xf32>
    %180 = vector.multi_reduction <add>, %12, %cst_30 [0] : vector<4x3x256xf32> to vector<3x256xf32>
    %cst_31 = arith.constant 4.000000e+00 : f32
    %181 = vector.broadcast %cst_31 : f32 to vector<3x256xf32>
    %182 = arith.divf %180, %181 : vector<3x256xf32>
    %cst_32 = arith.constant dense<0.000000e+00> : vector<1x256xf32>
    %183 = vector.multi_reduction <add>, %9, %cst_32 [0] : vector<4x1x256xf32> to vector<1x256xf32>
    %cst_33 = arith.constant 4.000000e+00 : f32
    %184 = vector.broadcast %cst_33 : f32 to vector<1x256xf32>
    %185 = arith.divf %183, %184 : vector<1x256xf32>
    %186 = vector.extract_strided_slice %8 {offsets = [3, 0], sizes = [3, 256], strides = [1, 1]} : vector<6x256xf32> to vector<3x256xf32>
    %cst_34 = arith.constant 1.000000e+00 : f32
    %187 = vector.broadcast %cst_34 : f32 to vector<1x256xf32>
    %188 = arith.subf %187, %185 : vector<1x256xf32>
    %189 = vector.broadcast %188 : vector<1x256xf32> to vector<3x256xf32>
    %190 = arith.mulf %186, %189 : vector<3x256xf32>
    %191 = arith.addf %190, %182 : vector<3x256xf32>
    %cst_35 = arith.constant dense<0.000000e+00> : vector<1x256xf32>
    %192 = vector.multi_reduction <add>, %13, %cst_35 [0] : vector<4x1x256xf32> to vector<1x256xf32>
    %cst_36 = arith.constant 4.000000e+00 : f32
    %193 = vector.broadcast %cst_36 : f32 to vector<1x256xf32>
    %194 = arith.divf %192, %193 : vector<1x256xf32>
    %cst_37 = arith.constant 0.000000e+00 : f32
    %195 = vector.broadcast %cst_37 : f32 to vector<1x256xf32>
    %196 = arith.cmpf ogt, %194, %195 : vector<1x256xf32>
    %197 = arith.extui %196 : vector<1x256xi1> to vector<1x256xi32>
    %198 = arith.sitofp %197 : vector<1x256xi32> to vector<1x256xf32>
    %199 = vector.extract_strided_slice %8 {offsets = [0, 0], sizes = [3, 256], strides = [1, 1]} : vector<6x256xf32> to vector<3x256xf32>
    %200 = arith.subf %191, %199 : vector<3x256xf32>
    %201 = math.absf %200 : vector<3x256xf32>
    %202 = vector.broadcast %198 : vector<1x256xf32> to vector<3x256xf32>
    %203 = arith.mulf %201, %202 : vector<3x256xf32>
    %204 = vector.shape_cast %203 : vector<3x256xf32> to vector<1x3x256xf32>
    %cst_38 = arith.constant dense<0.000000e+00> : vector<1xf32>
    %205 = vector.multi_reduction <add>, %204, %cst_38 [1, 2] : vector<1x3x256xf32> to vector<1xf32>
    %206 = vector.shape_cast %205 : vector<1xf32> to vector<1x1x1xf32>
    %207 = vector.extract %206[0, 0, 0] : f32 from vector<1x1x1xf32>
    %208 = vector.shape_cast %198 : vector<1x256xf32> to vector<1x1x256xf32>
    %cst_39 = arith.constant dense<0.000000e+00> : vector<1xf32>
    %209 = vector.multi_reduction <add>, %208, %cst_39 [1, 2] : vector<1x1x256xf32> to vector<1xf32>
    %210 = vector.shape_cast %209 : vector<1xf32> to vector<1x1x1xf32>
    %211 = vector.extract %210[0, 0, 0] : f32 from vector<1x1x1xf32>
    %cst_40 = arith.constant 1.000000e+00 : f32
    %212 = vector.broadcast %cst_40 : f32 to vector<4x1x256xf32>
    %213 = arith.subf %212, %9 : vector<4x1x256xf32>
    %cst_41 = arith.constant 0.000000e+00 : f32
    %214 = vector.broadcast %cst_41 : f32 to vector<4x1x256xf32>
    %215 = arith.subf %214, %9 : vector<4x1x256xf32>
    %cst_42 = arith.constant 1.1920929E-7 : f32
    %216 = vector.broadcast %cst_42 : f32 to vector<4x1x256xf32>
    %217 = arith.addf %9, %216 : vector<4x1x256xf32>
    %218 = math.log %217 : vector<4x1x256xf32>
    %cst_43 = arith.constant 2.000000e+00 : f32
    %219 = math.log %cst_43 : f32
    %220 = vector.broadcast %219 : f32 to vector<4x1x256xf32>
    %221 = arith.divf %218, %220 : vector<4x1x256xf32>
    %222 = arith.mulf %215, %221 : vector<4x1x256xf32>
    %cst_44 = arith.constant 1.1920929E-7 : f32
    %223 = vector.broadcast %cst_44 : f32 to vector<4x1x256xf32>
    %224 = arith.addf %213, %223 : vector<4x1x256xf32>
    %225 = math.log %224 : vector<4x1x256xf32>
    %cst_45 = arith.constant 2.000000e+00 : f32
    %226 = math.log %cst_45 : f32
    %227 = vector.broadcast %226 : f32 to vector<4x1x256xf32>
    %228 = arith.divf %225, %227 : vector<4x1x256xf32>
    %229 = arith.mulf %213, %228 : vector<4x1x256xf32>
    %230 = arith.subf %222, %229 : vector<4x1x256xf32>
    %231 = vector.shape_cast %230 : vector<4x1x256xf32> to vector<1x4x1x256xf32>
    %cst_46 = arith.constant dense<0.000000e+00> : vector<1xf32>
    %232 = vector.multi_reduction <add>, %231, %cst_46 [1, 2, 3] : vector<1x4x1x256xf32> to vector<1xf32>
    %233 = vector.shape_cast %232 : vector<1xf32> to vector<1x1x1x1xf32>
    %234 = vector.extract %233[0, 0, 0, 0] : f32 from vector<1x1x1x1xf32>
    %235 = tpu.iota {dimensions = array<i32: 0>} : vector<16x128xi32>
    %cst_47 = arith.constant 0.000000e+00 : f32
    %236 = vector.broadcast %cst_47 : f32 to vector<16x128xf32>
    %c0_i32_48 = arith.constant 0 : i32
    %237 = vector.broadcast %c0_i32_48 : i32 to vector<16x128xi32>
    %238 = arith.cmpi eq, %235, %237 : vector<16x128xi32>
    %cst_49 = arith.constant 0.000000e+00 : f32
    %239 = vector.broadcast %24 : f32 to vector<16x128xf32>
    %240 = vector.broadcast %cst_49 : f32 to vector<16x128xf32>
    %241 = arith.select %238, %239, %240 : vector<16x128xi1>, vector<16x128xf32>
    %242 = arith.addf %236, %241 : vector<16x128xf32>
    %c1_i32 = arith.constant 1 : i32
    %243 = vector.broadcast %c1_i32 : i32 to vector<16x128xi32>
    %244 = arith.cmpi eq, %235, %243 : vector<16x128xi32>
    %cst_50 = arith.constant 0.000000e+00 : f32
    %245 = vector.broadcast %31 : f32 to vector<16x128xf32>
    %246 = vector.broadcast %cst_50 : f32 to vector<16x128xf32>
    %247 = arith.select %244, %245, %246 : vector<16x128xi1>, vector<16x128xf32>
    %248 = arith.addf %242, %247 : vector<16x128xf32>
    %c2_i32 = arith.constant 2 : i32
    %249 = vector.broadcast %c2_i32 : i32 to vector<16x128xi32>
    %250 = arith.cmpi eq, %235, %249 : vector<16x128xi32>
    %cst_51 = arith.constant 0.000000e+00 : f32
    %251 = vector.broadcast %35 : f32 to vector<16x128xf32>
    %252 = vector.broadcast %cst_51 : f32 to vector<16x128xf32>
    %253 = arith.select %250, %251, %252 : vector<16x128xi1>, vector<16x128xf32>
    %254 = arith.addf %248, %253 : vector<16x128xf32>
    %c3_i32 = arith.constant 3 : i32
    %255 = vector.broadcast %c3_i32 : i32 to vector<16x128xi32>
    %256 = arith.cmpi eq, %235, %255 : vector<16x128xi32>
    %cst_52 = arith.constant 0.000000e+00 : f32
    %257 = vector.broadcast %43 : f32 to vector<16x128xf32>
    %258 = vector.broadcast %cst_52 : f32 to vector<16x128xf32>
    %259 = arith.select %256, %257, %258 : vector<16x128xi1>, vector<16x128xf32>
    %260 = arith.addf %254, %259 : vector<16x128xf32>
    %c4_i32 = arith.constant 4 : i32
    %261 = vector.broadcast %c4_i32 : i32 to vector<16x128xi32>
    %262 = arith.cmpi eq, %235, %261 : vector<16x128xi32>
    %cst_53 = arith.constant 0.000000e+00 : f32
    %263 = vector.broadcast %164 : f32 to vector<16x128xf32>
    %264 = vector.broadcast %cst_53 : f32 to vector<16x128xf32>
    %265 = arith.select %262, %263, %264 : vector<16x128xi1>, vector<16x128xf32>
    %266 = arith.addf %260, %265 : vector<16x128xf32>
    %c5_i32 = arith.constant 5 : i32
    %267 = vector.broadcast %c5_i32 : i32 to vector<16x128xi32>
    %268 = arith.cmpi eq, %235, %267 : vector<16x128xi32>
    %cst_54 = arith.constant 0.000000e+00 : f32
    %269 = vector.broadcast %156 : f32 to vector<16x128xf32>
    %270 = vector.broadcast %cst_54 : f32 to vector<16x128xf32>
    %271 = arith.select %268, %269, %270 : vector<16x128xi1>, vector<16x128xf32>
    %272 = arith.addf %266, %271 : vector<16x128xf32>
    %c6_i32 = arith.constant 6 : i32
    %273 = vector.broadcast %c6_i32 : i32 to vector<16x128xi32>
    %274 = arith.cmpi eq, %235, %273 : vector<16x128xi32>
    %cst_55 = arith.constant 0.000000e+00 : f32
    %275 = vector.broadcast %179 : f32 to vector<16x128xf32>
    %276 = vector.broadcast %cst_55 : f32 to vector<16x128xf32>
    %277 = arith.select %274, %275, %276 : vector<16x128xi1>, vector<16x128xf32>
    %278 = arith.addf %272, %277 : vector<16x128xf32>
    %c7_i32 = arith.constant 7 : i32
    %279 = vector.broadcast %c7_i32 : i32 to vector<16x128xi32>
    %280 = arith.cmpi eq, %235, %279 : vector<16x128xi32>
    %cst_56 = arith.constant 0.000000e+00 : f32
    %281 = vector.broadcast %207 : f32 to vector<16x128xf32>
    %282 = vector.broadcast %cst_56 : f32 to vector<16x128xf32>
    %283 = arith.select %280, %281, %282 : vector<16x128xi1>, vector<16x128xf32>
    %284 = arith.addf %278, %283 : vector<16x128xf32>
    %c8_i32 = arith.constant 8 : i32
    %285 = vector.broadcast %c8_i32 : i32 to vector<16x128xi32>
    %286 = arith.cmpi eq, %235, %285 : vector<16x128xi32>
    %cst_57 = arith.constant 0.000000e+00 : f32
    %287 = vector.broadcast %211 : f32 to vector<16x128xf32>
    %288 = vector.broadcast %cst_57 : f32 to vector<16x128xf32>
    %289 = arith.select %286, %287, %288 : vector<16x128xi1>, vector<16x128xf32>
    %290 = arith.addf %284, %289 : vector<16x128xf32>
    %c9_i32 = arith.constant 9 : i32
    %291 = vector.broadcast %c9_i32 : i32 to vector<16x128xi32>
    %292 = arith.cmpi eq, %235, %291 : vector<16x128xi32>
    %cst_58 = arith.constant 0.000000e+00 : f32
    %293 = vector.broadcast %234 : f32 to vector<16x128xf32>
    %294 = vector.broadcast %cst_58 : f32 to vector<16x128xf32>
    %295 = arith.select %292, %293, %294 : vector<16x128xi1>, vector<16x128xf32>
    %296 = arith.addf %290, %295 : vector<16x128xf32>
    %c0_59 = arith.constant 0 : index
    %c0_60 = arith.constant 0 : index
    %297 = vector.load %arg6[%c0_59, %c0_60] : memref<16x128xf32, #tpu.memory_space<vmem>>, vector<16x128xf32>
    %298 = arith.addf %297, %296 : vector<16x128xf32>
    %c0_61 = arith.constant 0 : index
    %c0_62 = arith.constant 0 : index
    %299 = vector.load %arg6[%c0_61, %c0_62] : memref<16x128xf32, #tpu.memory_space<vmem>>, vector<16x128xf32>
    tpu.vector_store %arg6[%c0_61, %c0_62], %298 {strides = array<i32>} : memref<16x128xf32, #tpu.memory_space<vmem>>, vector<16x128xf32>,
    %c0_i32_63 = arith.constant 0 : i32
    %300 = arith.cmpi eq, %arg1, %c0_i32_63 : i32
    %301 = arith.extui %300 : i1 to i32
    %c0_i32_64 = arith.constant 0 : i32
    %302 = arith.cmpi ne, %301, %c0_i32_64 : i32
    scf.if %302 {
      %c0_65 = arith.constant 0 : index
      %c0_66 = arith.constant 0 : index
      %303 = vector.load %arg6[%c0_65, %c0_66] : memref<16x128xf32, #tpu.memory_space<vmem>>, vector<16x128xf32>
      %304 = vector.extract_strided_slice %303 {offsets = [0, 0], sizes = [1, 128], strides = [1, 1]} : vector<16x128xf32> to vector<1x128xf32>
      %305 = vector.extract_strided_slice %303 {offsets = [1, 0], sizes = [1, 128], strides = [1, 1]} : vector<16x128xf32> to vector<1x128xf32>
      %306 = vector.extract_strided_slice %303 {offsets = [2, 0], sizes = [1, 128], strides = [1, 1]} : vector<16x128xf32> to vector<1x128xf32>
      %307 = vector.extract_strided_slice %303 {offsets = [3, 0], sizes = [1, 128], strides = [1, 1]} : vector<16x128xf32> to vector<1x128xf32>
      %308 = vector.extract_strided_slice %303 {offsets = [4, 0], sizes = [1, 128], strides = [1, 1]} : vector<16x128xf32> to vector<1x128xf32>
      %309 = vector.extract_strided_slice %303 {offsets = [5, 0], sizes = [1, 128], strides = [1, 1]} : vector<16x128xf32> to vector<1x128xf32>
      %310 = vector.extract_strided_slice %303 {offsets = [6, 0], sizes = [1, 128], strides = [1, 1]} : vector<16x128xf32> to vector<1x128xf32>
      %311 = vector.extract_strided_slice %303 {offsets = [7, 0], sizes = [1, 128], strides = [1, 1]} : vector<16x128xf32> to vector<1x128xf32>
      %312 = vector.extract_strided_slice %303 {offsets = [8, 0], sizes = [1, 128], strides = [1, 1]} : vector<16x128xf32> to vector<1x128xf32>
      %313 = vector.extract_strided_slice %303 {offsets = [9, 0], sizes = [1, 128], strides = [1, 1]} : vector<16x128xf32> to vector<1x128xf32>
      %cst_67 = arith.constant 1.1920929E-7 : f32
      %314 = vector.broadcast %cst_67 : f32 to vector<1x128xf32>
      %315 = arith.addf %304, %314 : vector<1x128xf32>
      %cst_68 = arith.constant 1.024000e+03 : f32
      %316 = vector.broadcast %cst_68 : f32 to vector<1x128xf32>
      %317 = arith.subf %316, %304 : vector<1x128xf32>
      %cst_69 = arith.constant 1.1920929E-7 : f32
      %318 = vector.broadcast %cst_69 : f32 to vector<1x128xf32>
      %319 = arith.addf %317, %318 : vector<1x128xf32>
      %cst_70 = arith.constant 3.000000e+00 : f32
      %320 = vector.broadcast %cst_70 : f32 to vector<1x128xf32>
      %321 = arith.mulf %320, %304 : vector<1x128xf32>
      %cst_71 = arith.constant 1.1920929E-7 : f32
      %322 = vector.broadcast %cst_71 : f32 to vector<1x128xf32>
      %323 = arith.addf %321, %322 : vector<1x128xf32>
      %cst_72 = arith.constant 5.000000e-01 : f32
      %324 = vector.broadcast %cst_72 : f32 to vector<1x128xf32>
      %325 = arith.mulf %324, %305 : vector<1x128xf32>
      %326 = arith.divf %325, %315 : vector<1x128xf32>
      %327 = arith.subf %306, %305 : vector<1x128xf32>
      %cst_73 = arith.constant 5.000000e-01 : f32
      %328 = vector.broadcast %cst_73 : f32 to vector<1x128xf32>
      %329 = arith.mulf %328, %327 : vector<1x128xf32>
      %330 = arith.divf %329, %319 : vector<1x128xf32>
      %331 = arith.addf %326, %330 : vector<1x128xf32>
      %cst_74 = arith.constant 2.000000e+00 : f32
      %332 = vector.broadcast %cst_74 : f32 to vector<1x128xf32>
      %333 = arith.mulf %332, %331 : vector<1x128xf32>
      %334 = arith.divf %307, %323 : vector<1x128xf32>
      %335 = arith.addf %333, %334 : vector<1x128xf32>
      %cst_75 = arith.constant 5.000000e-01 : f32
      %336 = vector.broadcast %cst_75 : f32 to vector<1x128xf32>
      %337 = arith.mulf %336, %308 : vector<1x128xf32>
      %338 = arith.divf %337, %315 : vector<1x128xf32>
      %339 = arith.subf %309, %308 : vector<1x128xf32>
      %cst_76 = arith.constant 5.000000e-01 : f32
      %340 = vector.broadcast %cst_76 : f32 to vector<1x128xf32>
      %341 = arith.mulf %340, %339 : vector<1x128xf32>
      %342 = arith.divf %341, %319 : vector<1x128xf32>
      %343 = arith.addf %338, %342 : vector<1x128xf32>
      %cst_77 = arith.constant 2.000000e+00 : f32
      %344 = vector.broadcast %cst_77 : f32 to vector<1x128xf32>
      %345 = arith.mulf %344, %343 : vector<1x128xf32>
      %346 = arith.divf %310, %323 : vector<1x128xf32>
      %347 = arith.addf %345, %346 : vector<1x128xf32>
      %348 = arith.minimumf %335, %347 : vector<1x128xf32>
      %cst_78 = arith.constant 0.00999999977 : f32
      %349 = vector.broadcast %cst_78 : f32 to vector<1x128xf32>
      %350 = arith.addf %312, %349 : vector<1x128xf32>
      %351 = arith.divf %311, %350 : vector<1x128xf32>
      %cst_79 = arith.constant 2.560000e+02 : f32
      %352 = vector.broadcast %cst_79 : f32 to vector<1x128xf32>
      %353 = arith.divf %313, %352 : vector<1x128xf32>
      %cst_80 = arith.constant 4.000000e+00 : f32
      %354 = vector.broadcast %cst_80 : f32 to vector<1x128xf32>
      %355 = arith.divf %353, %354 : vector<1x128xf32>
      %356 = tpu.iota {dimensions = array<i32: 0>} : vector<8x128xi32>
      %c0_i32_81 = arith.constant 0 : i32
      %357 = vector.broadcast %c0_i32_81 : i32 to vector<8x128xi32>
      %358 = arith.cmpi eq, %356, %357 : vector<8x128xi32>
      %cst_82 = arith.constant 0.000000e+00 : f32
      %359 = vector.shape_cast %348 : vector<1x128xf32> to vector<1x128xf32>
      %360 = vector.broadcast %359 : vector<1x128xf32> to vector<8x128xf32>
      %361 = vector.broadcast %cst_82 : f32 to vector<8x128xf32>
      %362 = arith.select %358, %360, %361 : vector<8x128xi1>, vector<8x128xf32>
      %c1_i32_83 = arith.constant 1 : i32
      %363 = vector.broadcast %c1_i32_83 : i32 to vector<8x128xi32>
      %364 = arith.cmpi eq, %356, %363 : vector<8x128xi32>
      %cst_84 = arith.constant 0.000000e+00 : f32
      %365 = vector.shape_cast %351 : vector<1x128xf32> to vector<1x128xf32>
      %366 = vector.broadcast %365 : vector<1x128xf32> to vector<8x128xf32>
      %367 = vector.broadcast %cst_84 : f32 to vector<8x128xf32>
      %368 = arith.select %364, %366, %367 : vector<8x128xi1>, vector<8x128xf32>
      %369 = arith.addf %362, %368 : vector<8x128xf32>
      %c2_i32_85 = arith.constant 2 : i32
      %370 = vector.broadcast %c2_i32_85 : i32 to vector<8x128xi32>
      %371 = arith.cmpi eq, %356, %370 : vector<8x128xi32>
      %cst_86 = arith.constant 0.000000e+00 : f32
      %372 = vector.shape_cast %355 : vector<1x128xf32> to vector<1x128xf32>
      %373 = vector.broadcast %372 : vector<1x128xf32> to vector<8x128xf32>
      %374 = vector.broadcast %cst_86 : f32 to vector<8x128xf32>
      %375 = arith.select %371, %373, %374 : vector<8x128xi1>, vector<8x128xf32>
      %376 = arith.addf %369, %375 : vector<8x128xf32>
      %c0_87 = arith.constant 0 : index
      %c0_88 = arith.constant 0 : index
      %c0_89 = arith.constant 0 : index
      %377 = vector.load %arg5[%c0_87, %c0_88, %c0_89] : memref<1x8x128xf32, #tpu.memory_space<vmem>>, vector<1x8x128xf32>
      %378 = vector.shape_cast %377 : vector<1x8x128xf32> to vector<8x128xf32>
      %379 = vector.shape_cast %376 : vector<8x128xf32> to vector<1x8x128xf32>
      tpu.vector_store %arg5[%c0_87, %c0_88, %c0_89], %379 {strides = array<i32>} : memref<1x8x128xf32, #tpu.memory_space<vmem>>, vector<1x8x128xf32>,
    } else {
    }
    return
  }
  func.func @transform_0(%arg0: i32, %arg1: i32) -> (i32, i32, i32, i32) {
    %c0_i32 = arith.constant 0 : i32
    %c0_i32_0 = arith.constant 0 : i32
    %c0_i32_1 = arith.constant 0 : i32
    return %arg0, %c0_i32, %c0_i32_0, %arg1 : i32, i32, i32, i32
  }
  func.func @transform_1(%arg0: i32, %arg1: i32) -> (i32, i32, i32, i32) {
    %c0_i32 = arith.constant 0 : i32
    %c0_i32_0 = arith.constant 0 : i32
    %c0_i32_1 = arith.constant 0 : i32
    return %arg0, %c0_i32, %c0_i32_0, %arg1 : i32, i32, i32, i32
  }
  func.func @transform_2(%arg0: i32, %arg1: i32) -> (i32, i32, i32) {
    %c0_i32 = arith.constant 0 : i32
    %c0_i32_0 = arith.constant 0 : i32
    return %arg0, %c0_i32, %arg1 : i32, i32, i32
  }
  func.func @transform_3(%arg0: i32, %arg1: i32) -> (i32, i32, i32) {
    %c0_i32 = arith.constant 0 : i32
    %c0_i32_0 = arith.constant 0 : i32
    %c0_i32_1 = arith.constant 0 : i32
    return %arg0, %c0_i32, %c0_i32_0 : i32, i32, i32
  }
}

</mosaic_0001>

<bundles_post_ra>
// kernel: tpu_custom_call.1
= control target key start
LH: loop header
LB: loop body
LE: loop exit
PB: predicated region body
PF: predicated region fallthrough
CT: control target
= control target key end

     0   :  { %s2711_s0 = inlined_call_operand.hbm [shape: f32[2,4,4,256], index: 0, kind: input, shape index: {}]   ;;  %s2712_s1 = inlined_call_operand.hbm [shape: f32[2,4,4,256], index: 1, kind: input, shape index: {}]   ;;  %s2713_s2 = inlined_call_operand.vmem [shape: f32[2,6,256], index: 2, kind: input, shape index: {}]   ;;  %s2714_s3 = inlined_call_operand.hbm [shape: f32[2,8,128], index: 3, kind: output, shape index: {}]  }
   0x1   :  { %2715 = sst [smem:[#allocation12_spill]] %s2711_s0 }
   0x2   :  { %8 = vsyncpa [#allocation4], 0 }
   0x3   :  { %10 = vsyncpa [#allocation4 + $0x1], 0 }
   0x4   :  { %11 = vsyncpa [#allocation7], 0 }
   0x5   :  { %13 = vsyncpa [#allocation7 + $0x1], 0 }
   0x6   :  { %14 = vsyncpa [#allocation5], 0 }
   0x7   :  { %16 = vsyncpa [#allocation5 + $0x1], 0  ;;  %s2011_s12 = smov 0   ;;  %s2013_s13 = smov 0  }
   0x8   :  { %s2015_s14 = smov 0   ;;  %s2017_s15 = smov 0  }
   0x9   :  { %s2019_s16 = smov 0   ;;  %s2021_s17 = smov 0  }
   0xa LB: > { %s1676_s18 = sadd.s32 4294967295, %s1983_s17   ;;  %s1677_s19 = sadd.s32 4294967294, %s1983_s17   ;;  %s1983_s17 = sphi %s2021_s17, %s22_s17   ;;  %s1979_s16 = sphi %s2019_s16, %s2728_s16   ;;  %s1975_s15 = sphi %s2017_s15, %s2727_s15   ;;  %s1971_s14 = sphi %s2015_s14, %s2726_s14   ;;  %s1967_s13 = sphi %s2013_s13, %s2725_s13   ;;  %s1963_s12 = sphi %s2011_s12, %s2724_s12  }
   0xb   : > { %s34_s20 = sadd.s32 1, %s1979_s16  ;;  %s43_s21 = sadd.s32 1, %s1971_s14 }
   0xc   : > { %p36_p0 = scmp.ge.s32.totalorder %s34_s20, 2  ;;  %p50_p1 = scmp.ne.s32.totalorder %s1971_s14, %s1967_s13 }
   0xd   : > { %p51_p2 = scmp.eq.s32.totalorder %s1983_s17, 0  ;;  %p56_p3 = scmp.ne.s32.totalorder %s1967_s13, %s1963_s12 }
   0xe   : > { %s2730_s20 = smov (%p36_p0, %s34_s20), 0  ;;  %p57_p5 = scmp.eq.s32.totalorder %s1676_s18, 0 }
   0xf   : > { %p2052_p4 = por %p51_p2, %p50_p1  ;;  %s38_s23 = ssub.s32 %s1979_s16, %s2730_s20 }
  0x10   : > { %p136_p6 = scmp.eq.s32.totalorder %s1676_s18, 1  ;;  %p41_p7 = scmp.eq.s32.totalorder %s38_s23, 0 }
  0x11   : > { %p2058_p8 = por %p57_p5, %p56_p3  ;;  %p142_p10 = scmp.eq.s32.totalorder %s1677_s19, 1 }
  0x12   : > { %p2062_p9 = por %p136_p6, %p50_p1  ;;  %p1760_p13 = scmp.lt.s32.totalorder %s1983_s17, 2 }
  0x13   : > { %s2067_s26 = scalar_select %p41_p7, %s1971_s14, %s43_s21  }
  0x14   : > { %p2069_p11 = por %p142_p10, %p56_p3  ;;  %s2076_s28 = sand.u32 1, %s1971_s14  }
  0x15   : > { %s1680_s29 = sshll.u32 %s2076_s28, 5  ;;  %s1702_s30 = sshll.u32 %s1979_s16, 9 }
  0x16   : > { %s2720_s0 = sld [smem:[#allocation12_spill]]  ;;  %s166_s7 = scalar_lea.vmem [#allocation3], %s1680_s29 }
  0x17   : > { %s175_s8 = sshll.u32 %s166_s7, 4  ;;  %p2089_p0 = pnand %p1760_p13, %p2052_p4  ;;  %s176_s8 = int_to_ptr.vmem [resolvable:$true] %s175_s8 }
  0x18   : > { %p1686_p1 = scmp.ge.s32.totalorder %s1983_s17, 1  ;;  %s163_s10 = scalar_lea.sflag [#allocation4], %s2076_s28 }
  0x19   : > { %p1845_p2 = pneg %p2089_p0  ;;  %s1856_s11 = scalar_lea.vmem %s176_s8, 512 }
  0x1a   : > { %p1857_p3 = scmp.ne.s32.totalorder %s176_s8, %s1856_s11  ;;  %s1985_s18 = smov [#allocation3]  }
  0x1b   : > { %s1861_s19 = sshll.u32 %s1985_s18, 4  ;;  %s1862_s19 = int_to_ptr.vmem [resolvable:$false] %s1861_s19 }
  0x1c   : > { %s174_s6 = scalar_lea.hbm %s2720_s0, %s1702_s30  ;;  %p1859_p5 = pnand %p1857_p3, %p1845_p2 }
  0x1d   : > { %s1863_s21 = scalar_lea.vmem %s1862_s19, 1024  ;;  %p1864_p4 = scmp.lt.s32.totalorder %s176_s8, %s1862_s19 }
  0x1e   : > { %p1860_p6 = pneg %p1859_p5  ;;  %p1865_p7 = scmp.lt.s32.totalorder %s1863_s21, %s1856_s11 }
  0x20   : > { %p1866_p10 = por %p1865_p7, %p1864_p4 }
  0x22   : > { %p1867_p13 = pnand %p1866_p10, %p1860_p6 }
  0x24   : > { %1870 = shalt.err (!%p1867_p13)
}
  0x25   : > { %s1986_s22 = smov 128   ;;  %s1987_s23 = smov 8  }
  0x26   : > { %1752 = dma.hbm_to_vmem [thread:$0]  (!%p2089_p0), %s174_s6, 512, %s176_s8, %s163_s10, %s1986_s22, %s1986_s22, %s1987_s23  }
  0x27   : > { %p219_p3 = scmp.lt.s32.totalorder %s1983_s17, 3  ;;  %s197_s7 = scalar_lea.hbm %s2712_s1, %s1702_s30 }
  0x28   : > { %s189_s18 = scalar_lea.vmem [#allocation6], %s1680_s29  ;;  %s186_s21 = scalar_lea.sflag [#allocation7], %s2076_s28 }
  0x29   : > { %p2110_p5 = pnand %p1686_p1, %p219_p3  ;;  %s198_s19 = sshll.u32 %s189_s18, 4  ;;  %s199_s19 = int_to_ptr.vmem [resolvable:$true] %s198_s19 }
  0x2a   : > { %s1884_s0 = scalar_lea.vmem %s199_s19, 512  ;;  %s1988_s6 = smov [#allocation6]  }
  0x2b   : > { %p1885_p6 = scmp.ne.s32.totalorder %s199_s19, %s1884_s0  ;;  %s1889_s8 = sshll.u32 %s1988_s6, 4  ;;  %s1890_s8 = int_to_ptr.vmem [resolvable:$false] %s1889_s8 }
  0x2c   : > { %s1891_s30 = scalar_lea.vmem %s1890_s8, 1024  ;;  %p1892_p10 = scmp.lt.s32.totalorder %s199_s19, %s1890_s8 }
  0x2d   : > { %p1887_p4 = pnand %p1885_p6, %p1845_p2  ;;  %p1893_p1 = scmp.lt.s32.totalorder %s1891_s30, %s1884_s0 }
  0x2f   : > { %p1888_p7 = pneg %p1887_p4  ;;  %p1894_p13 = por %p1893_p1, %p1892_p10 }
  0x31   : > { %p1895_p3 = pnand %p1894_p13, %p1888_p7 }
  0x33   : > { %1898 = shalt.err (!%p1895_p3)
}
  0x34   : > { %1755 = dma.hbm_to_vmem [thread:$0]  (!%p2089_p0), %s197_s7, 512, %s199_s19, %s186_s21, %s1986_s22, %s1986_s22, %s1987_s23  }
  0x35   : > { %223 = sbr.rel (%p2110_p5) target bundleno = 433 (0x1b1), region = 32  ;;  %s2125_s28 = sand.u32 (!%p2110_p5), 1, %s1967_s13  }
  0x36   : > { %s1687_s29 = sshll.u32 (!%p2110_p5), %s2125_s28, 5  ;;  %s226_s10 = scalar_lea.sflag (!%p2110_p5), [#allocation4], %s2125_s28 }
  0x37   : > { %s2129_s4 = scalar_lea.vmem (!%p2110_p5), [#allocation3], %s1687_s29 }
  0x3a   : > { %1950 = dma.done.wait (%p2058_p8), %s226_s10, 512  }
  0x3b   : > { %1952 = vsyncadd (%p2058_p8), %s226_s10, 4294966784  ;;  %s235_s0 = scalar_lea.sflag [#allocation7], %s2125_s28  ;;  %s2136_s9 = scalar_lea.vmem [#allocation6], %s1687_s29 }
  0x3c   : > { %1954 = dma.done.wait (%p2058_p8), %s235_s0, 512  }
  0x3d   : > { %1956 = vsyncadd (%p2058_p8), %s235_s0, 4294966784  ;;  %v307_v0 = vlaneseq  ;;  %v2151_v4 = vld [vmem:[%s2129_s4 + $0x8] sm:$0xff]  ;;  %v2154_v5 = vld [vmem:[%s2136_s9 + $0x10] sm:$0xff]  ;;  %vm551_vm0 = vcmask 1040384   ;;  %v1989_v16 = vmov 0.0   ;;  %vm796_vm5 = vcmask 1042432  }
  0x3e   : > { %v2157_v6 = vld [vmem:[%s2129_s4] sm:$0xff]  ;;  %v891_v7 = vsub.f32 %v2151_v4, %v2154_v5  ;;  %v2162_v8 = vld [vmem:[%s2136_s9 + $0x18] sm:$0xff]  ;;  %v2165_v9 = vld [vmem:[%s2129_s4 + $0x10] sm:$0xff]  ;;  %vm497_vm1 = vcmp.gt.f32.partialorder %v2154_v5, 0.0  ;;  %vm1130_vm6 = vcmask 1043459   ;;  %p278_p8 = scmp.lt.s32.totalorder %s1975_s15, 1 }
  0x3f   : > { %v2142_v1 = vshrl.u32 %v307_v0, 7  ;;  %v2168_v10 = vld [vmem:[%s2136_s9 + $0x8] sm:$0xff]  ;;  %v821_v13 = vsub.f32 %v2157_v6, %v2162_v8  ;;  %vm498_vm2 = vcmp.gt.f32.partialorder %v2162_v8, 0.0  ;;  %v2192_v19 = vsel %vm497_vm1, 1.0, %v1989_v16  ;;  %v2246_v0 = vld [vmem:[%s2136_s9] sm:$0xff] }
  0x40   : > { %v961_v14 = vsub.f32 %v2165_v9, %v2168_v10  ;;  %vm496_vm3 = vcmp.gt.f32.partialorder %v2168_v10, 0.0  ;;  %v892_v15 = vand.u32 2147483647, %v891_v7  ;;  %v2186_v17 = vsel %vm498_vm2, 1.0, %v1989_v16  ;;  %s2532_s24 = scalar_select %p278_p8, %s1975_s15, 1 }
  0x41   : > { %v2145_v2 = vsub.s32 3, %v2142_v1  ;;  %v2148_v3 = vsub.s32 7, %v2142_v1  ;;  %v2189_v18 = vsel %vm496_vm3, 1.0, %v1989_v16  ;;  %v822_v20 = vand.u32 2147483647, %v821_v13 }
  0x42   : > { %v962_v21 = vand.u32 2147483647, %v961_v14  ;;  %v917_v26 = vmul.f32 %v2192_v19, %v892_v15  ;;  %vm495_vm4 = vcmp.gt.f32.partialorder %v2246_v0, 0.0  ;;  %s1704_s22 = sshll.u32 %s2532_s24, 4  ;;  %vm1376_vm9 = vcmp.eq.s32.totalorder %v2142_v1, 1 }
  0x43   : > { %v2173_v11 = vrot.slane %v2151_v4, %v2145_v2  ;;  %v2177_v12 = vrot.slane %v2151_v4, %v2148_v3  ;;  %v2196_v22 = vrot.slane %v2165_v9, %v2145_v2  ;;  %v2200_v23 = vrot.slane %v2165_v9, %v2148_v3  ;;  %s285_s7 = scalar_lea.vmem %s2713_s2, %s1704_s22 }
  0x44   : > { %v897_v24 = vrot.slane %v892_v15, %v2145_v2  ;;  %v901_v25 = vrot.slane %v892_v15, %v2148_v3  ;;  %v827_v28 = vrot.slane %v822_v20, %v2145_v2  ;;  %v831_v29 = vrot.slane %v822_v20, %v2148_v3 }
  0x45   : > { %v358_v27 = vrot.slane %v2173_v11, %v2145_v2  ;;  %v847_v30 = vmul.f32 %v2186_v17, %v822_v20  ;;  %v967_v31 = vrot.slane %v962_v21, %v2145_v2  ;;  %v971_v34 = vrot.slane %v962_v21, %v2148_v3 }
  0x46   : > { %v904_v32 = vsel %vm551_vm0, %v897_v24, 0.0  ;;  %v905_v33 = vsel %vm551_vm0, %v901_v25, 0.0  ;;  %v987_v35 = vmul.f32 %v2189_v18, %v962_v21  ;;  %v834_v37 = vsel %vm551_vm0, %v827_v28, 0.0 }
  0x47   : > { %v906_v36 = vadd.f32 %v905_v33, %v904_v32  ;;  %v835_v38 = vsel %vm551_vm0, %v831_v29, 0.0  ;;  %v852_v39 = vrot.slane %v847_v30, %v2145_v2  ;;  %v856_v41 = vrot.slane %v847_v30, %v2148_v3 }
  0x48   : > { %v836_v40 = vadd.f32 %v835_v38, %v834_v37  ;;  %v974_v42 = vsel %vm551_vm0, %v967_v31, 0.0  ;;  %v975_v43 = vsel %vm551_vm0, %v971_v34, 0.0  ;;  %v992_v46 = vrot.slane %v987_v35, %v2145_v2 }
  0x49   : > { %907 = vadd.xlane.f32.xlu1 %v906_v36  ;;  %v859_v44 = vsel %vm551_vm0, %v852_v39, 0.0  ;;  %v976_v45 = vadd.f32 %v975_v43, %v974_v42  ;;  %v996_v47 = vrot.slane %v987_v35, %v2148_v3  ;;  %v860_v48 = vsel %vm551_vm0, %v856_v41, 0.0 }
  0x4a   : > { %837 = vadd.xlane.f32.xlu0 %v836_v40  ;;  %v922_v49 = vrot.slane %v917_v26, %v2145_v2  ;;  %v926_v50 = vrot.slane %v917_v26, %v2148_v3  ;;  %v362_v51 = vrot.slane %v2177_v12, %v2145_v2  ;;  %v861_v52 = vadd.f32 %v860_v48, %v859_v44 }
  0x4b   : > { %v999_v53 = vsel %vm551_vm0, %v992_v46, 0.0  ;;  %v1000_v54 = vsel %vm551_vm0, %v996_v47, 0.0  ;;  %v366_v55 = vrot.slane %v2196_v22, %v2145_v2  ;;  %v370_v59 = vrot.slane %v2200_v23, %v2145_v2 }
  0x4c   : > { %v1001_v56 = vadd.f32 %v1000_v54, %v999_v53  ;;  %v929_v57 = vsel %vm551_vm0, %v922_v49, 0.0  ;;  %v930_v58 = vsel %vm551_vm0, %v926_v50, 0.0  ;;  %v388_v61 = vcombine.low %v358_v27, %v362_v51  ;;  %v2316_v53 = vld [vmem:[%s2129_s4 + $0x18] sm:$0xff] }
  0x4d   : > { %862 = vadd.xlane.f32.xlu1 %v861_v52  ;;  %v931_v60 = vadd.f32 %v930_v58, %v929_v57  ;;  %v2239_v62 = vrot.slane %v2154_v5, %v2145_v2  ;;  %v2243_v63 = vrot.slane %v2154_v5, %v2148_v3  ;;  %v389_v7 = vcombine.low %v366_v55, %v370_v59 }
  0x4e   : > { %977 = vadd.xlane.f32.xlu0 %v976_v45  ;;  %v530_v13 = vrot.slane %v2192_v19, %v2145_v2  ;;  %v534_v14 = vrot.slane %v2192_v19, %v2148_v3  ;;  %v2254_v15 = vmul.f32 %v388_v61, %v2151_v4  ;;  %v2261_v24 = vsel %vm495_vm4, 1.0, %v1989_v16 }
  0x4f   : > { %v462_v20 = vrot.slane %v2239_v62, %v2145_v2  ;;  %v466_v21 = vrot.slane %v2243_v63, %v2145_v2  ;;  %v2264_v25 = vmul.f32 %v389_v7, %v2165_v9  ;;  %v2270_v28 = vrot.slane %v2261_v24, %v2145_v2 }
  0x50   : > { %v751_v26 = vrot.slane %v530_v13, %v2145_v2  ;;  %v755_v27 = vrot.slane %v534_v14, %v2145_v2  ;;  %v2274_v30 = vrot.slane %v2261_v24, %v2148_v3  ;;  %v2278_v31 = vrot.slane %v2189_v18, %v2145_v2 }
  0x51   : > { %1002 = vadd.xlane.f32.xlu1 %v1001_v56  ;;  %v485_v29 = vcombine.low %v462_v20, %v466_v21  ;;  %v2282_v32 = vrot.slane %v2189_v18, %v2148_v3  ;;  %v552_v34 = vsel %vm551_vm0, %v2270_v28, 0.0  ;;  %v2289_v36 = vrot.slane %v2186_v17, %v2145_v2 }
  0x52   : > { %932 = vadd.xlane.f32.xlu0 %v931_v60  ;;  %v774_v33 = vcombine.low %v751_v26, %v755_v27  ;;  %v553_v37 = vsel %vm551_vm0, %v2274_v30, 0.0  ;;  %v555_v38 = vsel %vm551_vm0, %v2278_v31, 0.0  ;;  %v2297_v39 = vrot.slane %v2186_v17, %v2148_v3 }
  0x53   : > { %v493_v35 = vmul.f32 %v485_v29, %v2154_v5  ;;  %v554_v40 = vadd.f32 %v553_v37, %v552_v34  ;;  %v557_v41 = vsel %vm551_vm0, %v2282_v32, 0.0  ;;  %v559_v42 = vsel %vm551_vm0, %v530_v13, 0.0 }
  0x54   : > { %v561_v45 = vsel %vm551_vm0, %v534_v14, 0.0  ;;  %v563_v46 = vsel %vm551_vm0, %v2289_v36, 0.0  ;;  %v565_v48 = vsel %vm551_vm0, %v2297_v39, 0.0  ;;  %v735_v49 = vrot.slane %v2270_v28, %v2145_v2 }
  0x55   : > { %v726_v43 = vsub.f32 %v2264_v25, %v493_v35  ;;  %v942_v44 = vsub.f32 %v2254_v15, %v493_v35  ;;  %v556_v47 = vadd.f32 %v555_v38, %v554_v40  ;;  %v576_v50 = vsub.f32 %v2157_v6, %v2246_v0 }
  0x56   : > { %v739_v52 = vrot.slane %v2274_v30, %v2145_v2  ;;  %v577_v54 = vsub.f32 %v2151_v4, %v2168_v10  ;;  %v578_v55 = vsub.f32 %v2165_v9, %v2154_v5  ;;  %v763_v57 = vrot.slane %v2297_v39, %v2145_v2 }
  0x57   : > { %v943_v51 = vand.u32 2147483647, %v942_v44  ;;  %v558_v56 = vadd.f32 %v557_v41, %v556_v47  ;;  %v579_v58 = vsub.f32 %v2316_v53, %v2162_v8  ;;  %v2326_v59 = vand.u32 2147483647, %v576_v50 }
  0x58   : > { %v730_v60 = vand.u32 2147483647, %v726_v43  ;;  %v2328_v7 = vand.u32 2147483647, %v577_v54  ;;  %v2330_v13 = vand.u32 2147483647, %v578_v55  ;;  %v2349_v40 = vrot.slane %v2157_v6, %v2145_v2 }
  0x59   : > { %v944_v61 = vmul.f32 %v943_v51, %v774_v33  ;;  %v560_v14 = vadd.f32 %v559_v42, %v558_v56  ;;  %v2332_v20 = vand.u32 2147483647, %v579_v58  ;;  %v663_v5 = vrot.slane %v2326_v59, %v2145_v2 }
  0x5a   : > { %v667_v21 = vrot.slane %v2326_v59, %v2148_v3  ;;  %v671_v29 = vrot.slane %v2328_v7, %v2145_v2  ;;  %v675_v34 = vrot.slane %v2328_v7, %v2148_v3  ;;  %v679_v37 = vrot.slane %v2330_v13, %v2145_v2 }
  0x5b   : > { %v946_v26 = vcombine.high %v944_v61, %v944_v61  ;;  %v948_v27 = vsel %vm796_vm5, %v944_v61, 0.0  ;;  %v562_v35 = vadd.f32 %v561_v45, %v560_v14  ;;  %v683_v38 = vrot.slane %v2330_v13, %v2148_v3 }
  0x5c   : > { %v687_v42 = vrot.slane %v2332_v20, %v2145_v2  ;;  %v700_v43 = vsel %vm551_vm0, %v663_v5, 0.0  ;;  %v701_v44 = vsel %vm551_vm0, %v667_v21, 0.0  ;;  %v703_v51 = vsel %vm551_vm0, %v671_v29, 0.0 }
  0x5d   : > { %v949_v41 = vsel %vm796_vm5, %v946_v26, 0.0  ;;  %v564_v47 = vadd.f32 %v563_v46, %v562_v35  ;;  %v702_v50 = vadd.f32 %v701_v44, %v700_v43  ;;  %v2357_v54 = vmul.f32 %v774_v33, %v730_v60 }
  0x5e   : > { %v950_v45 = vadd.f32 %v949_v41, %v948_v27  ;;  %v691_v55 = vrot.slane %v2332_v20, %v2148_v3  ;;  %v705_v56 = vsel %vm551_vm0, %v675_v34, 0.0  ;;  %v707_v58 = vsel %vm551_vm0, %v679_v37, 0.0 }
  0x5f   : > { %v566_v61 = vadd.f32 %v565_v48, %v564_v47  ;;  %v704_v14 = vadd.f32 %v703_v51, %v702_v50  ;;  %v709_v5 = vsel %vm551_vm0, %v683_v38, 0.0  ;;  %v2366_v46 = vrot.slane %v2157_v6, %v2148_v3 }
  0x60   : > { %951 = vadd.xlane.f32.xlu1 %v950_v45  ;;  %v711_v21 = vsel %vm551_vm0, %v687_v42, 0.0  ;;  %v350_v33 = vrot.slane %v2349_v40, %v2145_v2  ;;  %v2373_v60 = vrot.slane %v2162_v8, %v2145_v2  ;;  %v2377_v26 = vrot.slane %v2162_v8, %v2148_v3 }
  0x61   : > { %567 = vadd.xlane.f32.xlu0 %v566_v61  ;;  %v706_v48 = vadd.f32 %v705_v56, %v704_v14  ;;  %v354_v27 = vrot.slane %v2366_v46, %v2145_v2  ;;  %v2383_v29 = vrot.slane %v2168_v10, %v2145_v2  ;;  %v2387_v34 = vrot.slane %v2168_v10, %v2148_v3 }
  0x62   : > { %v470_v35 = vrot.slane %v2373_v60, %v2145_v2  ;;  %v474_v37 = vrot.slane %v2377_v26, %v2145_v2  ;;  %v759_v38 = vrot.slane %v2289_v36, %v2145_v2  ;;  %v743_v41 = vrot.slane %v2278_v31, %v2145_v2 }
  0x63   : > { %v708_v42 = vadd.f32 %v707_v58, %v706_v48  ;;  %v387_v43 = vcombine.low %v350_v33, %v354_v27  ;;  %v454_v44 = vrot.slane %v2383_v29, %v2145_v2  ;;  %v458_v45 = vrot.slane %v2387_v34, %v2145_v2 }
  0x64   : > { %v486_v47 = vcombine.low %v470_v35, %v474_v37  ;;  %v747_v50 = vrot.slane %v2282_v32, %v2145_v2  ;;  %v2405_v51 = vrot.slane %v2316_v53, %v2145_v2  ;;  %v2409_v36 = vrot.slane %v2316_v53, %v2148_v3 }
  0x65   : > { %v710_v31 = vadd.f32 %v709_v5, %v708_v42  ;;  %v713_v56 = vsel %vm551_vm0, %v691_v55, 0.0  ;;  %v484_v58 = vcombine.low %v454_v44, %v458_v45  ;;  %v2414_v61 = vrot.slane %v2246_v0, %v2145_v2 }
  0x66   : > { %v2417_v14 = vmul.f32 %v387_v43, %v2157_v6  ;;  %v494_v32 = vmul.f32 %v486_v47, %v2162_v8  ;;  %v374_v33 = vrot.slane %v2405_v51, %v2145_v2  ;;  %v378_v48 = vrot.slane %v2409_v36, %v2145_v2 }
  0x67   : > { %v712_v27 = vadd.f32 %v711_v21, %v710_v31  ;;  %v492_v5 = vmul.f32 %v484_v58, %v2168_v10  ;;  %v2427_v55 = vrot.slane %v2246_v0, %v2148_v3  ;;  %v446_v35 = vrot.slane %v2414_v61, %v2145_v2 }
  0x68   : > { %v775_v8 = vcombine.low %v759_v38, %v763_v57  ;;  %v872_v37 = vsub.f32 %v2417_v14, %v494_v32  ;;  %v773_v42 = vcombine.low %v743_v41, %v747_v50  ;;  %v390_v43 = vcombine.low %v374_v33, %v378_v48 }
  0x69   : > { %v714_v44 = vadd.f32 %v713_v56, %v712_v27  ;;  %v725_v21 = vsub.f32 %v2254_v15, %v492_v5  ;;  %v1012_v10 = vsub.f32 %v2264_v25, %v492_v5  ;;  %v450_v45 = vrot.slane %v2427_v55, %v2145_v2 }
  0x6a   : > { %v873_v47 = vand.u32 2147483647, %v872_v37  ;;  %v2440_v31 = vmul.f32 %v390_v43, %v2316_v53  ;;  %v2448_v39 = vcombine.low %v735_v49, %v739_v52  ;;  %v584_v50 = vmul.f32 %v2261_v24, %v2326_v59 }
  0x6b   : > { %715 = vadd.xlane.f32.xlu1 %v714_v44  ;;  %v729_v57 = vand.u32 2147483647, %v725_v21  ;;  %v1013_v38 = vand.u32 2147483647, %v1012_v10  ;;  %v483_v41 = vcombine.low %v446_v35, %v450_v45  ;;  %v790_v33 = vcombine.high %v2357_v54, %v2357_v54 }
  0x6c   : > { %v874_v56 = vmul.f32 %v873_v47, %v775_v8  ;;  %v727_v58 = vsub.f32 %v2440_v31, %v494_v32  ;;  %v2457_v30 = vsel %vm796_vm5, %v2357_v54, 0.0  ;;  %v585_v48 = vmul.f32 %v2189_v18, %v2328_v7 }
  0x6d   : > { %v781_v28 = vmul.f32 %v773_v42, %v729_v57  ;;  %v1014_v49 = vmul.f32 %v1013_v38, %v773_v42  ;;  %v491_v52 = vmul.f32 %v483_v41, %v2246_v0  ;;  %v586_v32 = vmul.f32 %v2192_v19, %v2330_v13 }
  0x6e   : > { %v876_v27 = vcombine.high %v874_v56, %v874_v56  ;;  %v878_v59 = vsel %vm796_vm5, %v874_v56, 0.0  ;;  %v731_v5 = vand.u32 2147483647, %v727_v58  ;;  %v587_v54 = vmul.f32 %v2186_v17, %v2332_v20 }
  0x6f   : > { %v789_v35 = vcombine.high %v781_v28, %v781_v28  ;;  %v1016_v37 = vcombine.high %v1014_v49, %v1014_v49  ;;  %v595_v43 = vrot.slane %v584_v50, %v2145_v2  ;;  %v1018_v44 = vsel %vm796_vm5, %v1014_v49, 0.0 }
  0x70   : > { %v879_v42 = vsel %vm796_vm5, %v876_v27, 0.0  ;;  %v724_v18 = vsub.f32 %v2417_v14, %v491_v52  ;;  %v783_v7 = vmul.f32 %v775_v8, %v731_v5  ;;  %v599_v45 = vrot.slane %v584_v50, %v2148_v3 }
  0x71   : > { %v880_v21 = vadd.f32 %v879_v42, %v878_v59  ;;  %v1019_v10 = vsel %vm796_vm5, %v1016_v37, 0.0  ;;  %v603_v19 = vrot.slane %v585_v48, %v2145_v2  ;;  %v800_v13 = vsel %vm796_vm5, %v781_v28, 0.0 }
  0x72   : > { %v728_v47 = vand.u32 2147483647, %v724_v18  ;;  %v791_v17 = vcombine.high %v783_v7, %v783_v7  ;;  %v806_v20 = vsel %vm796_vm5, %v790_v33, 0.0  ;;  %v1020_v57 = vadd.f32 %v1019_v10, %v1018_v44 }
  0x73   : > { %881 = vadd.xlane.f32.xlu0 %v880_v21  ;;  %v802_v38 = vsel %vm796_vm5, %v789_v35, 0.0  ;;  %v607_v41 = vrot.slane %v585_v48, %v2148_v3  ;;  %v611_v8 = vrot.slane %v586_v32, %v2145_v2  ;;  %v615_v50 = vrot.slane %v586_v32, %v2148_v3 }
  0x74   : > { %v780_v56 = vmul.f32 %v2448_v39, %v728_v47  ;;  %v619_v58 = vrot.slane %v587_v54, %v2145_v2  ;;  %v632_v28 = vsel %vm551_vm0, %v595_v43, 0.0  ;;  %v808_v49 = vsel %vm796_vm5, %v783_v7, 0.0 }
  0x75   : > { %v623_v33 = vrot.slane %v587_v54, %v2148_v3  ;;  %v633_v27 = vsel %vm551_vm0, %v599_v45, 0.0  ;;  %v635_v59 = vsel %vm551_vm0, %v603_v19, 0.0  ;;  %v2489_v35 = vsel %vm796_vm5, %v791_v17, 0.0 }
  0x76   : > { %v788_v5 = vcombine.high %v780_v56, %v780_v56  ;;  %v797_v48 = vsel %vm796_vm5, %v780_v56, 0.0  ;;  %v634_v37 = vadd.f32 %v633_v27, %v632_v28  ;;  %v637_v32 = vsel %vm551_vm0, %v607_v41, 0.0 }
  0x77   : > { %1021 = vadd.xlane.f32.xlu0 %v1020_v57  ;;  %v639_v43 = vsel %vm551_vm0, %v611_v8, 0.0  ;;  %v1031_v42 = vsub.f32 %v2316_v53, %v2246_v0  ;;  %v1082_v54 = vsub.f32 %v2440_v31, %v491_v52  ;;  %v641_v7 = vsel %vm551_vm0, %v615_v50, 0.0 }
  0x78   : > { %v798_v44 = vsel %vm796_vm5, %v788_v5, 0.0  ;;  %v636_v18 = vadd.f32 %v635_v59, %v634_v37  ;;  %v643_v21 = vsel %vm551_vm0, %v619_v58, 0.0  ;;  %v645_v45 = vsel %vm551_vm0, %v623_v33, 0.0 }
  0x79   : > { %v799_v10 = vadd.f32 %v798_v44, %v797_v48  ;;  %v1032_v19 = vand.u32 2147483647, %v1031_v42  ;;  %v1083_v47 = vand.u32 2147483647, %v1082_v54  ;;  %v1105_v0 = vcombine.high %v2417_v14, %v2417_v14 }
  0x7a   : > { %v638_v17 = vadd.f32 %v637_v32, %v636_v18  ;;  %v1113_v52 = vsel %vm796_vm5, %v2417_v14, 0.0  ;;  %v1114_v57 = vsel %vm796_vm5, %v2254_v15, 0.0  ;;  %v1116_v27 = vsel %vm796_vm5, %v2264_v25, 0.0 }
  0x7b   : > { %v801_v41 = vadd.f32 %v800_v13, %v799_v10  ;;  %v1037_v8 = vrot.slane %v1032_v19, %v2145_v2  ;;  %v1041_v56 = vrot.slane %v1032_v19, %v2148_v3  ;;  %v1057_v50 = vmul.f32 %v2261_v24, %v1032_v19 }
  0x7c   : > { %v640_v58 = vadd.f32 %v639_v43, %v638_v17  ;;  %v1084_v28 = vmul.f32 %v1083_v47, %v2448_v39  ;;  %v1115_v33 = vadd.f32 %v1114_v57, %v1113_v52  ;;  %v1106_v13 = vcombine.high %v2254_v15, %v2254_v15 }
  0x7d   : > { %v803_v59 = vadd.f32 %v802_v38, %v801_v41  ;;  %v1062_v14 = vrot.slane %v1057_v50, %v2145_v2  ;;  %v1107_v5 = vcombine.high %v2264_v25, %v2264_v25  ;;  %v1044_v48 = vsel %vm551_vm0, %v1037_v8, 0.0 }
  0x7e   : > { %v642_v24 = vadd.f32 %v641_v7, %v640_v58  ;;  %v1045_v39 = vsel %vm551_vm0, %v1041_v56, 0.0  ;;  %v1066_v37 = vrot.slane %v1057_v50, %v2148_v3  ;;  %v1086_v32 = vcombine.high %v1084_v28, %v1084_v28 }
  0x7f   : > { %v805_v38 = vadd.f32 %v2457_v30, %v803_v59  ;;  %v1108_v43 = vcombine.high %v2440_v31, %v2440_v31  ;;  %v1117_v42 = vadd.f32 %v1116_v27, %v1115_v33  ;;  %v1069_v54 = vsel %vm551_vm0, %v1062_v14, 0.0 }
  0x80   : > { %v644_v15 = vadd.f32 %v643_v21, %v642_v24  ;;  %v1070_v25 = vsel %vm551_vm0, %v1066_v37, 0.0  ;;  %v1118_v44 = vsel %vm796_vm5, %v2440_v31, 0.0  ;;  %v1046_v7 = vadd.f32 %v1045_v39, %v1044_v48  ;;  %v301_v39 = vld [vmem:[%s285_s7] sm:$0x3f] }
  0x81   : > { %v807_v18 = vadd.f32 %v806_v20, %v805_v38  ;;  %v1088_v10 = vsel %vm796_vm5, %v1084_v28, 0.0  ;;  %v1119_v30 = vadd.f32 %v1118_v44, %v1117_v42  ;;  %v1120_v47 = vsel %vm796_vm5, %v1105_v0, 0.0 }
  0x82   : > { %v646_v19 = vadd.f32 %v645_v45, %v644_v15  ;;  %v1121_v21 = vsel %vm796_vm5, %v1106_v13, 0.0  ;;  %v1123_v17 = vsel %vm796_vm5, %v1107_v5, 0.0  ;;  %v1071_v57 = vadd.f32 %v1070_v25, %v1069_v54  ;;  %v302_v15 = vld [vmem:[%s285_s7 + $0x8] sm:$0x3f] }
  0x83   : > { %v809_v52 = vadd.f32 %v808_v49, %v807_v18  ;;  %v1089_v31 = vsel %vm796_vm5, %v1086_v32, 0.0  ;;  %v1122_v20 = vadd.f32 %v1121_v21, %v1120_v47  ;;  %v1125_v41 = vsel %vm796_vm5, %v1108_v43, 0.0 }
  0x84   : > { %647 = vadd.xlane.f32.xlu0 %v646_v19  ;;  %v1131_v8 = vsel %vm1130_vm6, %v2349_v40, 0.0  ;;  %v1132_v45 = vsel %vm1130_vm6, %v2173_v11, 0.0  ;;  %v1134_v0 = vsel %vm1130_vm6, %v2196_v22, 0.0  ;;  %v1138_v58 = vsel %vm1130_vm6, %v2366_v46, 0.0 }
  0x85   : > { %v811_v56 = vadd.f32 %v2489_v35, %v809_v52  ;;  %v1124_v49 = vadd.f32 %v1123_v17, %v1122_v20  ;;  %v1133_v50 = vadd.f32 %v1132_v45, %v1131_v8  ;;  %v1128_v28 = vmul.f32 0.25, %v1119_v30 }
  0x86   : > { %v1136_v33 = vsel %vm1130_vm6, %v2405_v51, 0.0  ;;  %v1139_v40 = vsel %vm1130_vm6, %v2177_v12, 0.0  ;;  %v1141_v11 = vsel %vm1130_vm6, %v2200_v23, 0.0  ;;  %v1167_v59 = vsel %vm1130_vm6, %v2414_v61, 0.0 }
  0x87   : > { %812 = vadd.xlane.f32.xlu1 %v811_v56  ;;  %v1126_v22 = vadd.f32 %v1125_v41, %v1124_v49  ;;  %v1135_v27 = vadd.f32 %v1134_v0, %v1133_v50  ;;  %v1140_v35 = vadd.f32 %v1139_v40, %v1138_v58  ;;  %v1143_v46 = vsel %vm1130_vm6, %v2409_v36, 0.0 }
  0x88   : > { %1072 = vadd.xlane.f32.xlu0 %v1071_v57  ;;  %v1168_v12 = vsel %vm1130_vm6, %v2383_v29, 0.0  ;;  %v1170_v23 = vsel %vm1130_vm6, %v2239_v62, 0.0  ;;  %v1174_v51 = vsel %vm1130_vm6, %v2427_v55, 0.0  ;;  %v1090_v24 = vadd.f32 %v1089_v31, %v1088_v10 }
  0x89   : > { %v1129_v14 = vmul.f32 0.25, %v1126_v22  ;;  %v1137_v13 = vadd.f32 %v1136_v33, %v1135_v27  ;;  %v1142_v61 = vadd.f32 %v1141_v11, %v1140_v35  ;;  %v1169_v5 = vadd.f32 %v1168_v12, %v1167_v59 }
  0x8a   : > { %v1172_v48 = vsel %vm1130_vm6, %v2373_v60, 0.0  ;;  %v1175_v36 = vsel %vm1130_vm6, %v2387_v34, 0.0  ;;  %v1177_v62 = vsel %vm1130_vm6, %v2243_v63, 0.0  ;;  %v1161_v55 = vrot.slane %v1128_v28, 5 }
  0x8b   : > { %1047 = vadd.xlane.f32.xlu1 %v1046_v7  ;;  %v1144_v29 = vadd.f32 %v1143_v46, %v1142_v61  ;;  %v1145_v37 = vmul.f32 0.25, %v1137_v13  ;;  %v1171_v38 = vadd.f32 %v1170_v23, %v1169_v5  ;;  %v1176_v32 = vadd.f32 %v1175_v36, %v1174_v51 }
  0x8c   : > { %v1179_v43 = vsel %vm1130_vm6, %v2377_v26, 0.0  ;;  %v1191_v42 = vrot.slane %v301_v39, 5  ;;  %v1162_v25 = vrot.slane %v1129_v14, 5  ;;  %v1192_v18 = vrot.slane %v302_v15, 5 }
  0x8d   : > { %v1146_v54 = vmul.f32 0.25, %v1144_v29  ;;  %v1147_v60 = vsub.f32 1.0, %v1145_v37  ;;  %v1173_v44 = vadd.f32 %v1172_v48, %v1171_v38  ;;  %v1178_v34 = vadd.f32 %v1177_v62, %v1176_v32 }
  0x8e   : > { %v1245_v7 = vsub.f32 1.0, %v2157_v6  ;;  %v1246_v10 = vsub.f32 1.0, %v2151_v4  ;;  %v1247_v47 = vsub.f32 1.0, %v2165_v9  ;;  %v1248_v21 = vsub.f32 1.0, %v2316_v53 }
  0x8f   : > { %1091 = vadd.xlane.f32.xlu1 %v1090_v24  ;;  %v1148_v30 = vsub.f32 1.0, %v1146_v54  ;;  %v1152_v63 = vrot.slane %v1147_v60, %v2145_v2  ;;  %v1181_v19 = vmul.f32 0.25, %v1173_v44  ;;  %v1180_v26 = vadd.f32 %v1179_v43, %v1178_v34 }
  0x90   : > { %v1253_v17 = vadd.f32 1.1920929e-07, %v2157_v6  ;;  %v1254_v52 = vadd.f32 1.1920929e-07, %v2151_v4  ;;  %v1255_v20 = vadd.f32 1.1920929e-07, %v2165_v9  ;;  %v1256_v45 = vadd.f32 1.1920929e-07, %v2316_v53 }
  0x91   : > { %v1156_v57 = vrot.slane %v1148_v30, %v2145_v2  ;;  %v1157_v31 = vmul.f32 %v1152_v63, %v301_v39  ;;  %vm1183_vm7 = vcmp.gt.f32.partialorder %v1181_v19, 0.0  ;;  %v1182_v41 = vmul.f32 0.25, %v1180_v26 }
  0x92   : > { %v1696_v8 = vsel %vm1183_vm7, 1.0, %v1989_v16  ;;  %1813 = vlog2.f32 %v1253_v17  ;;  %v1274_v50 = vadd.f32 1.1920929e-07, %v1245_v7  ;;  %v1275_v58 = vadd.f32 1.1920929e-07, %v1246_v10 }
  0x93   : > { %v1158_v0 = vmul.f32 %v1156_v57, %v302_v15  ;;  %v1165_v56 = vadd.f32 %v1161_v55, %v1157_v31  ;;  %v1202_v49 = vrot.slane %v1696_v8, %v2145_v2  ;;  %1815 = vlog2.f32 %v1254_v52 }
  0x94   : > { %vm1184_vm8 = vcmp.gt.f32.partialorder %v1182_v41, 0.0  ;;  %1817 = vlog2.f32 %v1255_v20  ;;  %v1276_v22 = vadd.f32 1.1920929e-07, %v1247_v47  ;;  %v1277_v27 = vadd.f32 1.1920929e-07, %v1248_v21 }
  0x95   : > { %v1166_v28 = vadd.f32 %v1162_v25, %v1158_v0  ;;  %v1697_v33 = vsel %vm1184_vm8, 1.0, %v1989_v16  ;;  %v1195_v40 = vsub.f32 %v1165_v56, %v1191_v42  ;;  %1819 = vlog2.f32 %v1256_v45 }
  0x96   : > { %v1206_v11 = vrot.slane %v1697_v33, %v2145_v2  ;;  %1821 = vlog2.f32 %v1274_v50  ;;  %v1229_v46 = vrot.slane %v1696_v8, 3  ;;  %v1230_v12 = vrot.slane %v1697_v33, 3 }
  0x97   : > { %v1196_v35 = vsub.f32 %v1166_v28, %v1192_v18  ;;  %v1197_v59 = vand.u32 2147483647, %v1195_v40  ;;  %1823 = vlog2.f32 %v1275_v58  ;;  %v1249_v43 = vsub.f32 0.0, %v2157_v6 }
  0x98   : > { %1825 = vlog2.f32 %v1276_v22  ;;  %v1233_v16 = vsel %vm551_vm0, %v1229_v46, 0.0  ;;  %v1234_v14 = vsel %vm551_vm0, %v1230_v12, 0.0  ;;  %v1250_v60 = vsub.f32 0.0, %v2151_v4 }
  0x99   : > { %v1198_v23 = vand.u32 2147483647, %v1196_v35  ;;  %v1207_v51 = vmul.f32 %v1202_v49, %v1197_v59  ;;  %1827 = vlog2.f32 %v1277_v27  ;;  %v1235_v5 = vadd.f32 %v1234_v14, %v1233_v16 }
  0x9a   : > { %v1251_v18 = vsub.f32 0.0, %v2165_v9  ;;  %v1252_v26 = vsub.f32 0.0, %v2316_v53  ;;  %vm1369_vm10 = vcmp.eq.s32.totalorder %v2142_v1, 0  ;;  %vm1383_vm11 = vcmp.eq.s32.totalorder %v2142_v1, 2 }
  0x9b   : > { %v1208_v13 = vmul.f32 %v1206_v11, %v1198_v23  ;;  %v1211_v61 = vrot.slane %v1207_v51, 3  ;;  %1236 = vadd.xlane.f32.xlu1 %v1235_v5  ;;  %vm1390_vm12 = vcmp.eq.s32.totalorder %v2142_v1, 3  ;;  %vm1397_vm13 = vcmp.eq.s32.totalorder %v2142_v1, 4 }
  0x9c   : > { %vm1404_vm14 = vcmp.eq.s32.totalorder %v2142_v1, 5  ;;  %vm1411_vm15 = vcmp.eq.s32.totalorder %v2142_v1, 6 }
  0x9d   : > { %v1212_v24 = vrot.slane %v1208_v13, 3  ;;  %v1215_v48 = vsel %vm796_vm5, %v1211_v61, 0.0 }
  0x9f   : > { %v1814_v36 = vpop.eup %1813  ;;  %v1216_v39 = vsel %vm796_vm5, %v1212_v24, 0.0 }
  0xa0   : > { %v1816_v29 = vpop.eup %1815  ;;  %v1217_v37 = vadd.f32 %v1216_v39, %v1215_v48  ;;  %v1258_v38 = vmul.f32 0.6931472, %v1814_v36 }
  0xa1   : > { %v1818_v62 = vpop.eup %1817  ;;  %v1260_v55 = vmul.f32 0.6931472, %v1816_v29 }
  0xa2   : > { %v1820_v32 = vpop.eup %1819  ;;  %1218 = vadd.xlane.f32.xlu0 %v1217_v37  ;;  %v1262_v42 = vmul.f32 0.6931472, %v1818_v62  ;;  %v1266_v15 = vmul.f32 1.442695, %v1258_v38 }
  0xa3   : > { %v1822_v54 = vpop.eup %1821  ;;  %v1264_v25 = vmul.f32 0.6931472, %v1820_v32  ;;  %v1267_v44 = vmul.f32 1.442695, %v1260_v55 }
  0xa4   : > { %v1824_v34 = vpop.eup %1823  ;;  %v1268_v30 = vmul.f32 1.442695, %v1262_v42  ;;  %v1279_v63 = vmul.f32 0.6931472, %v1822_v54  ;;  %v1270_v31 = vmul.f32 %v1266_v15, %v1249_v43 }
  0xa5   : > { %v1826_v19 = vpop.eup %1825  ;;  %v1281_v17 = vmul.f32 0.6931472, %v1824_v34  ;;  %v1269_v57 = vmul.f32 1.442695, %v1264_v25  ;;  %v1271_v8 = vmul.f32 %v1267_v44, %v1250_v60 }
  0xa6   : > { %v1828_v52 = vpop.eup %1827  ;;  %v1283_v20 = vmul.f32 0.6931472, %v1826_v19  ;;  %v1286_v41 = vmul.f32 1.442695, %v1279_v63  ;;  %v1272_v56 = vmul.f32 %v1268_v30, %v1251_v18 }
  0xa7   : > { %v1285_v45 = vmul.f32 0.6931472, %v1828_v52  ;;  %v1287_v0 = vmul.f32 1.442695, %v1281_v17  ;;  %v1273_v33 = vmul.f32 %v1269_v57, %v1252_v26 }
  0xa8   : > { %v1288_v49 = vmul.f32 1.442695, %v1283_v20  ;;  %v1290_v50 = vmul.f32 %v1286_v41, %v1245_v7 }
  0xa9   : > { %v1289_v58 = vmul.f32 1.442695, %v1285_v45  ;;  %v1291_v28 = vmul.f32 %v1287_v0, %v1246_v10 }
  0xaa   : > { %v1292_v40 = vmul.f32 %v1288_v49, %v1247_v47  ;;  %v1294_v11 = vsub.f32 %v1270_v31, %v1290_v50 }
  0xab   : > { %v1293_v22 = vmul.f32 %v1289_v58, %v1248_v21  ;;  %v1295_v27 = vsub.f32 %v1271_v8, %v1291_v28 }
  0xac   : > { %v1296_v35 = vsub.f32 %v1272_v56, %v1292_v40  ;;  %v1305_v59 = vrot.slane %v1294_v11, %v2145_v2  ;;  %v1309_v46 = vrot.slane %v1294_v11, %v2148_v3 }
  0xad   : > { %v1313_v6 = vrot.slane %v1295_v27, %v2145_v2  ;;  %v1317_v7 = vrot.slane %v1295_v27, %v2148_v3  ;;  %v1297_v4 = vsub.f32 %v1273_v33, %v1293_v22 }
  0xae   : > { %v1321_v10 = vrot.slane %v1296_v35, %v2145_v2  ;;  %v1342_v9 = vsel %vm551_vm0, %v1305_v59, 0.0  ;;  %v1343_v47 = vsel %vm551_vm0, %v1309_v46, 0.0  ;;  %v1325_v21 = vrot.slane %v1296_v35, %v2148_v3 }
  0xaf   : > { %v1344_v12 = vadd.f32 %v1343_v47, %v1342_v9  ;;  %v1345_v53 = vsel %vm551_vm0, %v1313_v6, 0.0  ;;  %v1347_v23 = vsel %vm551_vm0, %v1317_v7, 0.0  ;;  %v1329_v16 = vrot.slane %v1297_v4, %v2145_v2 }
  0xb0   : > { %v1349_v14 = vsel %vm551_vm0, %v1321_v10, 0.0  ;;  %v1333_v61 = vrot.slane %v1297_v4, %v2148_v3  ;;  %v1351_v5 = vsel %vm551_vm0, %v1325_v21, 0.0 }
  0xb1   : > { %v1346_v51 = vadd.f32 %v1345_v53, %v1344_v12  ;;  %v1353_v48 = vsel %vm551_vm0, %v1329_v16, 0.0 }
  0xb2   : > { %v1355_v39 = vsel %vm551_vm0, %v1333_v61, 0.0  ;;  %vm1418_vm0 = vcmp.eq.s32.totalorder %v2142_v1, 7 }
  0xb3   : > { %v1348_v13 = vadd.f32 %v1347_v23, %v1346_v51 }
  0xb5   : > { %v1350_v24 = vadd.f32 %v1349_v14, %v1348_v13 }
  0xb7   : > { %v1352_v36 = vadd.f32 %v1351_v5, %v1350_v24 }
  0xb9   : > { %v1354_v29 = vadd.f32 %v1353_v48, %v1352_v36 }
  0xbb   : > { %v1356_v37 = vadd.f32 %v1355_v39, %v1354_v29 }
  0xbd   : > { %1357 = vadd.xlane.f32.xlu0 %v1356_v37 }
  0xd2   : > { %v908_v2 = vpop.xlane.xlu1 %907 }
  0xd3   : > { %v838_v38 = vpop.xlane.xlu0 %837  ;;  %v909_v17 = vrot.slane %v908_v2, 4 }
  0xd4   : > { %v839_v19 = vrot.slane %v838_v38, 4 }
  0xd5   : > { %v910_v8 = vadd.f32 %v909_v17, %v908_v2 }
  0xd6   : > { %v863_v54 = vpop.xlane.xlu1 %862  ;;  %v840_v31 = vadd.f32 %v839_v19, %v838_v38 }
  0xd7   : > { %v978_v62 = vpop.xlane.xlu0 %977  ;;  %v864_v52 = vrot.slane %v863_v54, 4  ;;  %v911_v22 = vrot.slane %v910_v8, 2 }
  0xd8   : > { %v841_v49 = vrot.slane %v840_v31, 2  ;;  %v979_v50 = vrot.slane %v978_v62, 4 }
  0xd9   : > { %v865_v45 = vadd.f32 %v864_v52, %v863_v54  ;;  %v912_v61 = vadd.f32 %v911_v22, %v910_v8 }
  0xda   : > { %v1003_v34 = vpop.xlane.xlu1 %1002  ;;  %v980_v4 = vadd.f32 %v979_v50, %v978_v62  ;;  %v842_v12 = vadd.f32 %v841_v49, %v840_v31 }
  0xdb   : > { %v933_v55 = vpop.xlane.xlu0 %932  ;;  %v1004_v33 = vrot.slane %v1003_v34, 4  ;;  %v866_v27 = vrot.slane %v865_v45, 2 }
  0xdc   : > { %v934_v0 = vrot.slane %v933_v55, 4  ;;  %v981_v29 = vrot.slane %v980_v4, 2 }
  0xdd   : > { %v1005_v53 = vadd.f32 %v1004_v33, %v1003_v34  ;;  %v867_v13 = vadd.f32 %v866_v27, %v865_v45 }
  0xde   : > { %v935_v35 = vadd.f32 %v934_v0, %v933_v55  ;;  %v982_v31 = vadd.f32 %v981_v29, %v980_v4 }
  0xdf   : > { %v1006_v55 = vrot.slane %v1005_v53, 2  ;;  %v868_v54 = vrot.slane %v867_v13, 1 }
  0xe0   : > { %v936_v16 = vrot.slane %v935_v35, 2 }
  0xe1   : > { %v1007_v8 = vadd.f32 %v1006_v55, %v1005_v53 }
  0xe3   : > { %v1008_v27 = vrot.slane %v1007_v8, 1 }
  0xe9   : > { %v952_v18 = vpop.xlane.xlu1 %951 }
  0xea   : > { %v568_v32 = vpop.xlane.xlu0 %567  ;;  %v953_v56 = vrot.slane %v952_v18, 4 }
  0xeb   : > { %v569_v43 = vrot.slane %v568_v32, 4 }
  0xec   : > { %v954_v59 = vadd.f32 %v953_v56, %v952_v18 }
  0xed   : > { %v570_v42 = vadd.f32 %v569_v43, %v568_v32  ;;  %v843_v32 = vrot.slane %v842_v12, 1 }
  0xee   : > { %v955_v5 = vrot.slane %v954_v59, 2 }
  0xef   : > { %v571_v15 = vrot.slane %v570_v42, 2  ;;  %v844_v0 = vadd.f32 %v843_v32, %v842_v12 }
  0xf1   : > { %v572_v60 = vadd.f32 %v571_v15, %v570_v42 }
  0xf3   : > { %v573_v25 = vrot.slane %v572_v60, 1 }
  0xf4   : > { %v716_v63 = vpop.xlane.xlu1 %715 }
  0xf5   : > { %v574_v44 = vadd.f32 %v573_v25, %v572_v60  ;;  %v717_v26 = vrot.slane %v716_v63, 4  ;;  %v937_v60 = vadd.f32 %v936_v16, %v935_v35 }
  0xf7   : > { %1705 = vpush %v574_v44  ;;  %v718_v20 = vadd.f32 %v717_v26, %v716_v63  ;;  %v938_v56 = vrot.slane %v937_v60, 1 }
  0xf9   : > { %v719_v58 = vrot.slane %v718_v20, 2 }
  0xfb   : > { %v720_v47 = vadd.f32 %v719_v58, %v718_v20 }
  0xfc   : > { %v882_v30 = vpop.xlane.xlu0 %881 }
  0xfd   : > { %v883_v41 = vrot.slane %v882_v30, 4  ;;  %v721_v62 = vrot.slane %v720_v47, 1 }
  0xff   : > { %v884_v40 = vadd.f32 %v883_v41, %v882_v30  ;;  %v956_v30 = vadd.f32 %v955_v5, %v954_v59  ;;  %v722_v26 = vadd.f32 %v721_v62, %v720_v47  ;;  %v1009_v47 = vadd.f32 %v1008_v27, %v1007_v8 }
 0x100   : > { %v1022_v57 = vpop.xlane.xlu0 %1021 }
 0x101   : > { %v1023_v46 = vrot.slane %v1022_v57, 4  ;;  %v885_v21 = vrot.slane %v884_v40, 2  ;;  %v957_v33 = vrot.slane %v956_v30, 1 }
 0x103   : > { %v1024_v24 = vadd.f32 %v1023_v46, %v1022_v57  ;;  %v886_v43 = vadd.f32 %v885_v21, %v884_v40  ;;  %v913_v57 = vrot.slane %v912_v61, 1  ;;  %v939_v46 = vadd.f32 %v938_v56, %v937_v60 }
 0x104   : > { %v958_v4 = vadd.f32 %v957_v33, %v956_v30 }
 0x105   : > { %v1025_v25 = vrot.slane %v1024_v24, 2  ;;  %v887_v52 = vrot.slane %v886_v43, 1  ;;  %v914_v22 = vadd.f32 %v913_v57, %v912_v61 }
 0x107   : > { %v1026_v49 = vadd.f32 %v1025_v25, %v1024_v24  ;;  %v888_v40 = vadd.f32 %v887_v52, %v886_v43 }
 0x10d   : > { %v648_v28 = vpop.xlane.xlu0 %647 }
 0x10e   : > { %v649_v11 = vrot.slane %v648_v28, 4 }
 0x110   : > { %v813_v6 = vpop.xlane.xlu1 %812  ;;  %v650_v7 = vadd.f32 %v649_v11, %v648_v28  ;;  %v869_v28 = vadd.f32 %v868_v54, %v867_v13  ;;  %v983_v11 = vrot.slane %v982_v31, 1 }
 0x111   : > { %v814_v10 = vrot.slane %v813_v6, 4  ;;  %v1073_v9 = vpop.xlane.xlu0 %1072 }
 0x112   : > { %v651_v23 = vrot.slane %v650_v7, 2  ;;  %v1074_v51 = vrot.slane %v1073_v9, 4 }
 0x113   : > { %v815_v14 = vadd.f32 %v814_v10, %v813_v6  ;;  %v1027_v6 = vrot.slane %v1026_v49, 1 }
 0x114   : > { %v1048_v48 = vpop.xlane.xlu1 %1047  ;;  %v1075_v36 = vadd.f32 %v1074_v51, %v1073_v9  ;;  %v652_v39 = vadd.f32 %v651_v23, %v650_v7  ;;  %v984_v9 = vadd.f32 %v983_v11, %v982_v31 }
 0x115   : > { %v816_v37 = vrot.slane %v815_v14, 2  ;;  %v1049_v38 = vrot.slane %v1048_v48, 4  ;;  %v1028_v53 = vadd.f32 %v1027_v6, %v1026_v49 }
 0x116   : > { %v653_v2 = vrot.slane %v652_v39, 1  ;;  %v1076_v44 = vrot.slane %v1075_v36, 2 }
 0x117   : > { %v1050_v42 = vadd.f32 %v1049_v38, %v1048_v48  ;;  %v817_v15 = vadd.f32 %v816_v37, %v815_v14 }
 0x118   : > { %v1092_v34 = vpop.xlane.xlu1 %1091  ;;  %v654_v18 = vadd.f32 %v653_v2, %v652_v39  ;;  %v1077_v50 = vadd.f32 %v1076_v44, %v1075_v36 }
 0x119   : > { %v1051_v63 = vrot.slane %v1050_v42, 2  ;;  %v1093_v19 = vrot.slane %v1092_v34, 4  ;;  %v818_v17 = vrot.slane %v817_v15, 1 }
 0x11a   : > { %1707 = vpush %v654_v18  ;;  %v1078_v7 = vrot.slane %v1077_v50, 1 }
 0x11b   : > { %v1094_v20 = vadd.f32 %v1093_v19, %v1092_v34  ;;  %1709 = vpush %v722_v26  ;;  %v819_v41 = vadd.f32 %v818_v17, %v817_v15  ;;  %v1052_v45 = vadd.f32 %v1051_v63, %v1050_v42 }
 0x11c   : > { %v1079_v21 = vadd.f32 %v1078_v7, %v1077_v50 }
 0x11d   : > { %v1095_v58 = vrot.slane %v1094_v20, 2  ;;  %1711 = vpush %v819_v41  ;;  %v1053_v35 = vrot.slane %v1052_v45, 1 }
 0x11e   : > { %1713 = vpush %v844_v0 }
 0x11f   : > { %1715 = vpush %v869_v28  ;;  %v1096_v59 = vadd.f32 %v1095_v58, %v1094_v20  ;;  %v1054_v12 = vadd.f32 %v1053_v35, %v1052_v45 }
 0x120   : > { %1717 = vpush %v888_v40 }
 0x121   : > { %1719 = vpush %v914_v22  ;;  %v1097_v10 = vrot.slane %v1096_v59, 1 }
 0x122   : > { %1721 = vpush %v939_v46 }
 0x123   : > { %1723 = vpush %v958_v4  ;;  %v1098_v23 = vadd.f32 %v1097_v10, %v1096_v59 }
 0x124   : > { %1725 = vpush %v984_v9  ;;  %v1237_v51 = vpop.xlane.xlu1 %1236  ;;  %v1368_v9 = vadd.s32 8, %v2142_v1 }
 0x125   : > { %1727 = vpush %v1009_v47  ;;  %v1238_v16 = vrot.slane %v1237_v51, 4 }
 0x126   : > { %1729 = vpush %v1028_v53  ;;  %vm1426_vm1 = vcmp.eq.s32.totalorder %v1368_v9, 8  ;;  %vm1433_vm2 = vcmp.eq.s32.totalorder %v1368_v9, 9 }
 0x127   : > { %1731 = vpush %v1054_v12  ;;  %v1239_v14 = vadd.f32 %v1238_v16, %v1237_v51 }
 0x128   : > { %1733 = vpush %v1079_v21  ;;  %s1706_s11 = spop %1705 }
 0x129   : > { %1735 = vpush %v1098_v23  ;;  %v1240_v61 = vrot.slane %v1239_v14, 2  ;;  %v1371_v60 = vstv %s1706_s11 }
 0x12a   : > { %v1372_v34 = vsel %vm1369_vm10, %v1371_v60, 0.0 }
 0x12b   : > { %v1219_v13 = vpop.xlane.xlu0 %1218  ;;  %v1241_v24 = vadd.f32 %v1240_v61, %v1239_v14 }
 0x12c   : > { %v1220_v5 = vrot.slane %v1219_v13, 4 }
 0x12d   : > { %v1242_v39 = vrot.slane %v1241_v24, 1 }
 0x12e   : > { %v1221_v48 = vadd.f32 %v1220_v5, %v1219_v13 }
 0x12f   : > { %v1243_v38 = vadd.f32 %v1242_v39, %v1241_v24 }
 0x130   : > { %v1222_v36 = vrot.slane %v1221_v48, 2 }
 0x132   : > { %v1223_v29 = vadd.f32 %v1222_v36, %v1221_v48 }
 0x134   : > { %v1224_v37 = vrot.slane %v1223_v29, 1 }
 0x136   : > { %v1225_v62 = vadd.f32 %v1224_v37, %v1223_v29 }
 0x138   : > { %1737 = vpush %v1225_v62 }
 0x139   : > { %1739 = vpush %v1243_v38 }
 0x146   : > { %v1358_v55 = vpop.xlane.xlu0 %1357 }
 0x147   : > { %v1359_v2 = vrot.slane %v1358_v55, 4 }
 0x149   : > { %v1360_v32 = vadd.f32 %v1359_v2, %v1358_v55 }
 0x14b   : > { %v1361_v43 = vrot.slane %v1360_v32, 2  ;;  %s1708_s18 = spop %1707 }
 0x14c   : > { %s1710_s19 = spop %1709  ;;  %v1378_v15 = vstv %s1708_s18 }
 0x14d   : > { %v1362_v42 = vadd.f32 %v1361_v43, %v1360_v32  ;;  %v1379_v44 = vsel %vm1376_vm9, %v1378_v15, 0.0  ;;  %v1385_v30 = vstv %s1710_s19 }
 0x14e   : > { %s2631_s21 = spop %1711  ;;  %v1381_v18 = vadd.f32 %v1379_v44, %v1372_v34  ;;  %v1386_v63 = vsel %vm1383_vm11, %v1385_v30, 0.0 }
 0x14f   : > { %v1363_v54 = vrot.slane %v1362_v42, 1  ;;  %s1714_s6 = spop %1713  ;;  %v1392_v26 = vstv %s2631_s21 }
 0x150   : > { %s1716_s8 = spop %1715  ;;  %v1388_v19 = vadd.f32 %v1386_v63, %v1381_v18  ;;  %v1393_v17 = vsel %vm1390_vm12, %v1392_v26, 0.0 }
 0x151   : > { %v1364_v25 = vadd.f32 %v1363_v54, %v1362_v42  ;;  %s2636_s30 = spop %1717 }
 0x152   : > { %s1720_s29 = spop %1719  ;;  %v1395_v52 = vadd.f32 %v1393_v17, %v1388_v19  ;;  %v1521_v17 = vsub.s32 1, %v2142_v1 }
 0x153   : > { %1741 = vpush %v1364_v25  ;;  %s916_s10 = sadd.f32 %s1720_s29, %s1714_s6  ;;  %s1722_s4 = spop %1721 }
 0x154   : > { %s941_s0 = sadd.f32 %s1722_s4, %s1716_s8  ;;  %s1724_s9 = spop %1723 }
 0x155   : > { %s1726_s24 = spop %1725  ;;  %s960_s18 = sadd.f32 %s1724_s9, %s2636_s30 }
 0x156   : > { %s1728_s22 = spop %1727  ;;  %s986_s7 = sadd.f32 %s1726_s24, %s916_s10 }
 0x157   : > { %s1011_s23 = sadd.f32 %s1728_s22, %s941_s0  ;;  %s1730_s5 = spop %1729 }
 0x158   : > { %s1732_s11 = spop %1731  ;;  %s1030_s4 = sadd.f32 %s1730_s5, %s960_s18 }
 0x159   : > { %s1734_s6 = spop %1733  ;;  %s1056_s19 = sadd.f32 %s1732_s11, %s986_s7 }
 0x15a   : > { %s1081_s29 = sadd.f32 %s1734_s6, %s1011_s23  ;;  %s1736_s8 = spop %1735 }
 0x15b   : > { %v1406_v20 = vstv %s1056_s19  ;;  %s1100_s0 = sadd.f32 %s1736_s8, %s1030_s4  ;;  %s1689_s9 = sshll.u32 %s2125_s28, 3 }
 0x15c   : > { %v1399_v57 = vstv %s1081_s29  ;;  %v1407_v8 = vsel %vm1404_vm14, %v1406_v20, 0.0  ;;  %s1699_s24 = sshll.u32 %s1975_s15, 7  ;;  %s274_s22 = scalar_lea.vmem [#allocation8], %s1689_s9 }
 0x15d   : > { %v1400_v31 = vsel %vm1397_vm13, %v1399_v57, 0.0  ;;  %v1413_v0 = vstv %s1100_s0  ;;  %s1551_s23 = sshll.u32 %s274_s22, 4  ;;  %s1549_s11 = scalar_lea.hbm %s2714_s3, %s1699_s24  ;;  %s1552_s23 = int_to_ptr.vmem [resolvable:$true] %s1551_s23 }
 0x15e   : > { %v1402_v41 = vadd.f32 %v1400_v31, %v1395_v52  ;;  %v1414_v56 = vsel %vm1411_vm15, %v1413_v0, 0.0  ;;  %s1538_s18 = scalar_lea.sflag [#allocation5], %s2125_s28  ;;  %s1899_s6 = scalar_lea.vmem %s1552_s23, 128 }
 0x15f   : > { %p1900_p0 = scmp.ne.s32.totalorder %s1552_s23, %s1899_s6  ;;  %s1990_s15 = smov [#allocation8]  }
 0x160   : > { %v1409_v45 = vadd.f32 %v1407_v8, %v1402_v41  ;;  %s1903_s29 = sshll.u32 %s1990_s15, 4  ;;  %s1904_s29 = int_to_ptr.vmem [resolvable:$false] %s1903_s29 }
 0x161   : > { %p1901_p2 = pnand %p1900_p0, %p2062_p9  ;;  %s1905_s19 = scalar_lea.vmem %s1904_s29, 256 }
 0x162   : > { %v1416_v49 = vadd.f32 %v1414_v56, %v1409_v45  ;;  %p1906_p6 = scmp.lt.s32.totalorder %s1552_s23, %s1904_s29  ;;  %p1907_p4 = scmp.lt.s32.totalorder %s1905_s19, %s1899_s6 }
 0x163   : > { %p1902_p5 = pneg %p1901_p2 }
 0x164   : > { %p1908_p7 = por %p1907_p4, %p1906_p6 }
 0x166   : > { %p1909_p10 = pnand %p1908_p7, %p1902_p5 }
 0x169   : > { %s1738_s21 = spop %1737 }
 0x16a   : > { %v1420_v50 = vstv %s1738_s21  ;;  %s1740_s30 = spop %1739 }
 0x16b   : > { %v1421_v58 = vsel %vm1418_vm0, %v1420_v50, 0.0  ;;  %v1427_v53 = vstv %s1740_s30 }
 0x16c   : > { %v2650_v28 = vadd.f32 %v1421_v58, %v1416_v49  ;;  %v1429_v13 = vsel %vm1426_vm1, %v1427_v53, 0.0 }
 0x16e   : > { %v1450_v33 = vadd.f32 1.1920929e-07, %v2650_v28  ;;  %v1451_v40 = vsub.f32 1024.0, %v2650_v28  ;;  %v1453_v11 = vmul.f32 3.0, %v2650_v28  ;;  %v1462_v4 = vrot.slane %v2650_v28, 7 }
 0x16f   : > { %v1455_v61 = vmul.f32 0.5, %v2650_v28 }
 0x170   : > { %v1452_v22 = vadd.f32 1.1920929e-07, %v1451_v40  ;;  %v1454_v27 = vadd.f32 1.1920929e-07, %v1453_v11  ;;  %v1485_v35 = vrot.slane %v1450_v33, 4  ;;  %v1457_v7 = vrot.slane %v1450_v33, 7 }
 0x171   : > { %v1464_v47 = vsub.f32 %v2650_v28, %v1462_v4 }
 0x172   : > { %v1467_v59 = vrot.slane %v1452_v22, 6  ;;  %v1489_v46 = vrot.slane %v1452_v22, 3  ;;  %v1498_v6 = vrot.slane %v1454_v27, 2  ;;  %v1477_v10 = vrot.slane %v1454_v27, 5 }
 0x173   : > { %v1465_v21 = vmul.f32 0.5, %v1464_v47 }
 0x174   : > { %1829 = vrcp.f32 %v1467_v59 }
 0x175   : > { %1831 = vrcp.f32 %v1485_v35 }
 0x176   : > { %1833 = vrcp.f32 %v1489_v46 }
 0x177   : > { %1835 = vrcp.f32 %v1498_v6 }
 0x178   : > { %1837 = vrcp.f32 %v1457_v7 }
 0x179   : > { %1839 = vrcp.f32 %v1477_v10 }
 0x181   : > { %v1830_v12 = vpop.eup %1829 }
 0x182   : > { %v1832_v23 = vpop.eup %1831  ;;  %v1470_v16 = vmul.f32 %v1830_v12, %v1465_v21 }
 0x183   : > { %v1834_v51 = vpop.eup %1833  ;;  %v1488_v39 = vmul.f32 %v1832_v23, %v1455_v61 }
 0x184   : > { %v1836_v14 = vpop.eup %1835  ;;  %s1742_s10 = spop %1741  ;;  %v1492_v5 = vmul.f32 %v1834_v51, %v1465_v21  ;;  %v1472_v38 = vrot.slane %v1470_v16, 1 }
 0x185   : > { %v1434_v24 = vstv %s1742_s10  ;;  %v1838_v48 = vpop.eup %1837  ;;  %v1501_v62 = vmul.f32 %v1836_v14, %v2650_v28 }
 0x186   : > { %v1436_v36 = vsel %vm1433_vm2, %v1434_v24, 0.0  ;;  %v1494_v29 = vrot.slane %v1492_v5, 1  ;;  %v1460_v2 = vmul.f32 %v1838_v48, %v1455_v61  ;;  %v1840_v43 = vpop.eup %1839 }
 0x187   : > { %v1438_v37 = vadd.f32 %v1436_v36, %v1429_v13  ;;  %v1503_v54 = vrot.slane %v1501_v62, 2  ;;  %v1480_v25 = vmul.f32 %v1840_v43, %v2650_v28 }
 0x188   : > { %v1496_v55 = vadd.f32 %v1494_v29, %v1488_v39  ;;  %v1474_v15 = vadd.f32 %v1472_v38, %v1460_v2 }
 0x189   : > { %v1510_v32 = vadd.f32 0.01, %v1438_v37  ;;  %v1482_v18 = vrot.slane %v1480_v25, 2  ;;  %v1517_v26 = vmul.f32 0.00390625, %v1438_v37 }
 0x18a   : > { %v1497_v42 = vmul.f32 2.0, %v1496_v55  ;;  %v1475_v34 = vmul.f32 2.0, %v1474_v15 }
 0x18b   : > { %v1512_v60 = vrot.slane %v1510_v32, 1  ;;  %v1518_v52 = vmul.f32 0.25, %v1517_v26 }
 0x18c   : > { %v1505_v44 = vadd.f32 %v1503_v54, %v1497_v42  ;;  %v1484_v63 = vadd.f32 %v1482_v18, %v1475_v34 }
 0x18d   : > { %1841 = vrcp.f32 %v1512_v60  ;;  %v1533_v45 = vrot.slane %v1518_v52, %v1521_v17 }
 0x18e   : > { %v1507_v30 = vrot.slane %v1505_v44, 3 }
 0x18f   : > { %v1534_v49 = vsel %vm1383_vm11, %v1533_v45, 0.0 }
 0x190   : > { %v1509_v19 = vmin.f32 %v1484_v63, %v1507_v30 }
 0x192   : > { %v1522_v57 = vrot.slane %v1509_v19, %v1521_v17 }
 0x194   : > { %v1523_v41 = vsel %vm1369_vm10, %v1522_v57, 0.0 }
 0x19a   : > { %v1842_v31 = vpop.eup %1841 }
 0x19b   : > { %v1515_v20 = vmul.f32 %v1842_v31, %v2650_v28 }
 0x19d   : > { %v1527_v8 = vrot.slane %v1515_v20, %v2148_v3 }
 0x19f   : > { %v1528_v0 = vsel %vm1376_vm9, %v1527_v8, 0.0 }
 0x1a0   : > { %v1529_v56 = vadd.f32 %v1528_v0, %v1523_v41 }
 0x1a2   : > { %v1535_v50 = vadd.f32 %v1534_v49, %v1529_v56 }
 0x1a4   : > { %1536 = vst [vmem:[%s274_s22] sm:$0xff] %v1535_v50 }
 0x1a5   : > { %1912 = shalt.err (!%p1909_p10)
}
 0x1a6   : > { %s1913_s8 = scalar_lea.hbm %s1549_s11, 128  ;;  %s1917_s0 = scalar_lea.hbm %s2714_s3, 256 }
 0x1a7   : > { %p1914_p1 = scmp.ne.s32.totalorder %s1549_s11, %s1913_s8  ;;  %p1918_p8 = scmp.lt.s32.totalorder %s1549_s11, %s2714_s3 }
 0x1a8   : > { %p1919_p0 = scmp.lt.s32.totalorder %s1917_s0, %s1913_s8 }
 0x1a9   : > { %p1915_p13 = pnand %p1914_p1, %p2062_p9 }
 0x1aa   : > { %p1920_p2 = por %p1919_p0, %p1918_p8 }
 0x1ab   : > { %p1916_p3 = pneg %p1915_p13 }
 0x1ad   : > { %p1921_p12 = pnand %p1920_p2, %p1916_p3 }
 0x1af   : > { %1924 = shalt.err (!%p1921_p12)
}
 0x1b0   : > { %1747 = dma.vmem_to_hbm [thread:$0]  (%p2062_p9), %s1552_s23, 128, %s1549_s11, %s1538_s18  }
 0x1b1 PF: > { %s1563_s10 = sand.u32 1, %s1963_s12   ;;  %p2723_p5 = scmp.ge.s32.totalorder %s1983_s17, 2 }
 0x1b2   : > { %s1564_s9 = scalar_lea.sflag [#allocation5], %s1563_s10 }
 0x1b3   : > { %p1757_p6 = pnand %p2723_p5, %p2069_p11 }
 0x1b5   : > { %p1758_p4 = pneg %p1757_p6 }
 0x1b7   : > { %1958 = dma.done.wait (%p1758_p4), %s1564_s9, 128  }
 0x1b8   : > { %1960 = vsyncadd (%p1758_p4), %s1564_s9, 4294967168  ;;  %s22_s17 = sadd.s32 1, %s1983_s17   ;;  %s2724_s12 = smov %s1967_s13 }
 0x1b9   : > { %p19_p7 = scmp.ge.s32.totalorder %s22_s17, 4   ;;  %s2725_s13 = smov %s1971_s14 }
 0x1ba   : > { %s2726_s14 = smov %s2067_s26  ;;  %s2727_s15 = smov %s1979_s16 }
 0x1bb   : > { %s2728_s16 = smov %s2730_s20  ;;  %21 = sbr.rel (!%p19_p7) target bundleno = 10 (0xa), region = 101 }
 0x1c0   :  { %1569 = vsyncpa [#allocation4], 1 }
 0x1c1   :  { %1571 = vsyncpa [#allocation4 + $0x1], 1 }
 0x1c2   :  { %1572 = vsyncpa [#allocation7], 1 }
 0x1c3   :  { %1574 = vsyncpa [#allocation7 + $0x1], 1 }
 0x1c4   :  { %1575 = vsyncpa [#allocation5], 1 }
 0x1c5   :  { %1577 = vsyncpa [#allocation5 + $0x1], 1 }

</bundles_post_ra>
